<compile_context>
chip_gen: v7x
topology: tpu7x:2x2x1
jax: 0.10.0
libtpu: 0.0.40
codegen_flags: <defaults>
</compile_context>

<pallas_src>
import jax
import jax.numpy as jnp
from jax.experimental import pallas as pl
from jax.experimental.pallas import tpu as pltpu

HIDDEN = 256  # fixed by the module: Linear(features, 256)


def classifier_kernel(x_ref, w1_ref, b1_ref, w2_ref, b2_ref, o_ref):
    # x_ref : [TM, F]   streamed batch tile (double-buffered by Pallas)
    # w1_ref: [F, 256]  resident in VMEM across the whole grid
    # b1_ref: [1, 256]
    # w2_ref: [1, 256]  second Linear's weight as a row vector
    # b2_ref: [1, 1]
    # o_ref : [TM, 1]
    h = jnp.dot(x_ref[...], w1_ref[...], preferred_element_type=jnp.float32)
    h = jnp.maximum(h + b1_ref[...], 0.0)                       # Linear + ReLU
    # Second Linear (256 -> 1): a matmul with N=1 would waste 255/256 of the
    # MXU lanes; do it as a VPU multiply + lane reduction instead.
    z = jnp.sum(h * w2_ref[...], axis=-1, keepdims=True) + b2_ref[...]
    o_ref[...] = jax.nn.sigmoid(z)                              # exp on EUP


def _round_up(x, m):
    return ((x + m - 1) // m) * m


def _pick_batch_tile(n, f, hidden, budget_bytes=16 << 20):
    """Largest 128-aligned batch tile whose footprint (double-buffered x tile
    + resident w1/biases + f32 activation) fits a conservative VMEM budget
    (safe on v7x's 64 MiB physical VMEM as well as v5e/v6e)."""
    resident = f * hidden * 4 + 2 * hidden * 4 + 4          # w1 + b1 + w2 + b2
    tm = 128
    for cand in (1024, 512, 256, 128):
        need = resident + 2 * cand * f * 4 + cand * hidden * 4 + 2 * cand * 4
        if need <= budget_bytes:
            tm = cand
            break
    # Don't tile far past the (padded) batch for small inputs.
    return min(tm, max(128, _round_up(n, 128)))


def classifier_forward(x_nchw, w1, b1, w2, b2, *, use_bf16=False):
    """x_nchw: [N, C, H, W] float32 -> [N, 1] float32.

    w1: [F, 256], b1: [256], w2: [256, 1], b2: [1]  (weights pre-transposed
    vs. PyTorch so the kernel runs plain row-major matmuls on the MXU).
    """
    n = x_nchw.shape[0]
    f = x_nchw.shape[1] * x_nchw.shape[2] * x_nchw.shape[3]
    hidden = w1.shape[1]

    # TODO(synk): the real `encoder` module is a constructor argument not
    # present in the source file; modeled here as a flatten.
    x_flat = x_nchw.reshape(n, f).astype(jnp.float32)

    tm = _pick_batch_tile(n, f, hidden)
    n_pad = _round_up(n, tm)
    if n_pad != n:
        x_flat = jnp.pad(x_flat, ((0, n_pad - n), (0, 0)))

    w1_k = w1
    x_k = x_flat
    if use_bf16:
        # MXU inputs in bf16, f32 accumulation; bias/ReLU/reduce stay f32.
        x_k = x_k.astype(jnp.bfloat16)
        w1_k = w1_k.astype(jnp.bfloat16)

    grid = (n_pad // tm,)
    out = pl.pallas_call(
        classifier_kernel,
        out_shape=jax.ShapeDtypeStruct((n_pad, 1), jnp.float32),
        grid=grid,
        in_specs=[
            pl.BlockSpec((tm, f), lambda i: (i, 0)),        # x: streamed tiles
            pl.BlockSpec((f, hidden), lambda i: (0, 0)),    # w1: resident
            pl.BlockSpec((1, hidden), lambda i: (0, 0)),    # b1: resident
            pl.BlockSpec((1, hidden), lambda i: (0, 0)),    # w2 row: resident
            pl.BlockSpec((1, 1), lambda i: (0, 0)),         # b2: resident
        ],
        out_specs=pl.BlockSpec((tm, 1), lambda i: (i, 0)),
        compiler_params=pltpu.CompilerParams(
            dimension_semantics=("parallel",),              # megacore on v7x
            vmem_limit_bytes=32 << 20,                      # headroom on v7x
        ),
    )(
        x_k,
        w1_k,
        b1.reshape(1, hidden).astype(jnp.float32),
        w2.reshape(1, hidden).astype(jnp.float32),
        b2.reshape(1, 1).astype(jnp.float32),
    )
    return out[:n]


def init_params(key, features, hidden=HIDDEN, out=1):
    """Deterministic init matching torch.nn.Linear defaults:
    U(-1/sqrt(fan_in), 1/sqrt(fan_in)) for both weight and bias."""
    k1, k2, k3, k4 = jax.random.split(key, 4)
    lim1 = 1.0 / jnp.sqrt(features)
    lim2 = 1.0 / jnp.sqrt(hidden)
    w1 = jax.random.uniform(k1, (features, hidden), jnp.float32, -lim1, lim1)
    b1 = jax.random.uniform(k2, (hidden,), jnp.float32, -lim1, lim1)
    w2 = jax.random.uniform(k3, (hidden, out), jnp.float32, -lim2, lim2)
    b2 = jax.random.uniform(k4, (out,), jnp.float32, -lim2, lim2)
    return w1, b1, w2, b2


if __name__ == "__main__":
    key = jax.random.PRNGKey(0)
    kx, kp = jax.random.split(key)

    # Small NCHW input: batch=2, channels=4, spatial=16x16 -> features=1024
    x = jax.random.normal(kx, (2, 4, 16, 16), jnp.float32)
    features = 4 * 16 * 16
    w1, b1, w2, b2 = init_params(kp, features)

    y = classifier_forward(x, w1, b1, w2, b2)
    jax.block_until_ready(y)

    # Reference check in plain JAX
    x_flat = x.reshape(2, features)
    h = jnp.maximum(x_flat @ w1 + b1, 0.0)
    y_ref = jax.nn.sigmoid(h @ w2 + b2)
    assert y.shape == (2, 1)
    assert jnp.allclose(y, y_ref, atol=1e-5, rtol=1e-5), float(
        jnp.max(jnp.abs(y - y_ref)))

    print("KERNEL_OK")
</pallas_src>

<mosaic_0001>
module attributes {stable_mosaic.version = 11 : i64} {
  func.func @classifier_kernel(%arg0: i32, %arg1: memref<128x1024xf32, #tpu.memory_space<vmem>>, %arg2: memref<1024x256xf32, #tpu.memory_space<vmem>>, %arg3: memref<1x256xf32, #tpu.memory_space<vmem>>, %arg4: memref<1x256xf32, #tpu.memory_space<vmem>>, %arg5: memref<1x1xf32, #tpu.memory_space<vmem>>, %arg6: memref<128x1xf32, #tpu.memory_space<vmem>>) attributes {dimension_semantics = [#tpu.dimension_semantics<parallel>], iteration_bounds = array<i64: 1>, scalar_prefetch = 0 : i64, scratch_operands = 0 : i64, tpu.core_type = #tpu.core_type<tc>, window_params = [{transform_indices = @transform_0, window_bounds = array<i64: 128, 1024>}, {pipeline_mode = #tpu.pipeline_mode<synchronous>, transform_indices = @transform_1, window_bounds = array<i64: 1024, 256>}, {pipeline_mode = #tpu.pipeline_mode<synchronous>, transform_indices = @transform_2, window_bounds = array<i64: 1, 256>}, {pipeline_mode = #tpu.pipeline_mode<synchronous>, transform_indices = @transform_3, window_bounds = array<i64: 1, 256>}, {pipeline_mode = #tpu.pipeline_mode<synchronous>, transform_indices = @transform_4, window_bounds = array<i64: 1, 1>}, {transform_indices = @transform_5, window_bounds = array<i64: 128, 1>}]} {
    %c0 = arith.constant 0 : index
    %c0_0 = arith.constant 0 : index
    %0 = vector.load %arg1[%c0, %c0_0] : memref<128x1024xf32, #tpu.memory_space<vmem>>, vector<128x1024xf32>
    %c0_1 = arith.constant 0 : index
    %c0_2 = arith.constant 0 : index
    %1 = vector.load %arg2[%c0_1, %c0_2] : memref<1024x256xf32, #tpu.memory_space<vmem>>, vector<1024x256xf32>
    %cst = arith.constant dense<0.000000e+00> : vector<128x256xf32>
    %2 = tpu.matmul %0, %1, %cst {dimension_numbers = #tpu.dot_dimension_numbers<[1], [0], [0], [1], [0, 0, 1, 1], [], []>} : vector<128x1024xf32>, vector<1024x256xf32>, vector<128x256xf32> -> vector<128x256xf32>
    %c0_3 = arith.constant 0 : index
    %c0_4 = arith.constant 0 : index
    %3 = vector.load %arg3[%c0_3, %c0_4] : memref<1x256xf32, #tpu.memory_space<vmem>>, vector<1x256xf32>
    %4 = vector.broadcast %3 : vector<1x256xf32> to vector<128x256xf32>
    %5 = arith.addf %2, %4 : vector<128x256xf32>
    %cst_5 = arith.constant 0.000000e+00 : f32
    %6 = vector.broadcast %cst_5 : f32 to vector<128x256xf32>
    %7 = arith.maximumf %5, %6 : vector<128x256xf32>
    %c0_6 = arith.constant 0 : index
    %c0_7 = arith.constant 0 : index
    %8 = vector.load %arg4[%c0_6, %c0_7] : memref<1x256xf32, #tpu.memory_space<vmem>>, vector<1x256xf32>
    %9 = vector.broadcast %8 : vector<1x256xf32> to vector<128x256xf32>
    %10 = arith.mulf %7, %9 : vector<128x256xf32>
    %cst_8 = arith.constant dense<0.000000e+00> : vector<128xf32>
    %11 = vector.multi_reduction <add>, %10, %cst_8 [1] : vector<128x256xf32> to vector<128xf32>
    %12 = vector.shape_cast %11 : vector<128xf32> to vector<128x1xf32>
    %c0_9 = arith.constant 0 : index
    %c0_10 = arith.constant 0 : index
    %13 = vector.load %arg5[%c0_9, %c0_10] : memref<1x1xf32, #tpu.memory_space<vmem>>, vector<1x1xf32>
    %14 = vector.broadcast %13 : vector<1x1xf32> to vector<128x1xf32>
    %15 = arith.addf %12, %14 : vector<128x1xf32>
    %16 = arith.negf %15 : vector<128x1xf32>
    %17 = math.exp %16 : vector<128x1xf32>
    %cst_11 = arith.constant 1.000000e+00 : f32
    %18 = vector.broadcast %cst_11 : f32 to vector<128x1xf32>
    %19 = arith.addf %18, %17 : vector<128x1xf32>
    %20 = arith.divf %18, %19 : vector<128x1xf32>
    %c0_12 = arith.constant 0 : index
    %c0_13 = arith.constant 0 : index
    %21 = vector.load %arg6[%c0_12, %c0_13] : memref<128x1xf32, #tpu.memory_space<vmem>>, vector<128x1xf32>
    tpu.vector_store %arg6[%c0_12, %c0_13], %20 {strides = array<i32>} : memref<128x1xf32, #tpu.memory_space<vmem>>, vector<128x1xf32>,
    return
  }
  func.func @transform_0(%arg0: i32) -> (i32, i32) {
    %c0_i32 = arith.constant 0 : i32
    %c0_i32_0 = arith.constant 0 : i32
    return %arg0, %c0_i32 : i32, i32
  }
  func.func @transform_1(%arg0: i32) -> (i32, i32) {
    %c0_i32 = arith.constant 0 : i32
    %c0_i32_0 = arith.constant 0 : i32
    %c0_i32_1 = arith.constant 0 : i32
    return %c0_i32, %c0_i32_0 : i32, i32
  }
  func.func @transform_2(%arg0: i32) -> (i32, i32) {
    %c0_i32 = arith.constant 0 : i32
    %c0_i32_0 = arith.constant 0 : i32
    %c0_i32_1 = arith.constant 0 : i32
    return %c0_i32, %c0_i32_0 : i32, i32
  }
  func.func @transform_3(%arg0: i32) -> (i32, i32) {
    %c0_i32 = arith.constant 0 : i32
    %c0_i32_0 = arith.constant 0 : i32
    %c0_i32_1 = arith.constant 0 : i32
    return %c0_i32, %c0_i32_0 : i32, i32
  }
  func.func @transform_4(%arg0: i32) -> (i32, i32) {
    %c0_i32 = arith.constant 0 : i32
    %c0_i32_0 = arith.constant 0 : i32
    %c0_i32_1 = arith.constant 0 : i32
    return %c0_i32, %c0_i32_0 : i32, i32
  }
  func.func @transform_5(%arg0: i32) -> (i32, i32) {
    %c0_i32 = arith.constant 0 : i32
    %c0_i32_0 = arith.constant 0 : i32
    return %arg0, %c0_i32 : i32, i32
  }
}

</mosaic_0001>

<bundles_post_ra>
// kernel: tpu_custom_call.1
= control target key start
LH: loop header
LB: loop body
LE: loop exit
PB: predicated region body
PF: predicated region fallthrough
CT: control target
= control target key end

     0   :  { %s2098_s0 = inlined_call_operand.hbm [shape: f32[128,1024], index: 0, kind: input, shape index: {}]   ;;  %s2099_s1 = inlined_call_operand.hbm [shape: f32[1024,256], index: 1, kind: input, shape index: {}]   ;;  %s2100_s2 = inlined_call_operand.vmem [shape: f32[1,256], index: 2, kind: input, shape index: {}]   ;;  %s2101_s3 = inlined_call_operand.vmem [shape: f32[1,256], index: 3, kind: input, shape index: {}]   ;;  %s2102_s4 = inlined_call_operand.<no memory space> [shape: f32[1,1], index: 4, kind: input, shape index: {}]   ;;  %s2103_s5 = inlined_call_operand.vmem [shape: f32[128,1], index: 5, kind: output, shape index: {}]  }
   0x1   :  { %v10_v0 = vstv %s2102_s4 }
   0x2   :  { %11 = vst [vmem:[#allocation2] sm:$0x1] %v10_v0 }
   0x3   :  { %12 = vsyncpa [#allocation4], 0 }
   0x4   :  { %13 = vsyncpa [#allocation6], 0  ;;  %s1875_s20 = smov [#allocation3]   ;;  %s1827_s24 = scalar_lea.hbm %s2098_s0, 16384 }
   0x5   :  { %s19_s21 = sshll.u32 %s1875_s20, 4  ;;  %p1828_p0 = scmp.ne.s32.totalorder %s2098_s0, %s1827_s24  ;;  %s20_s21 = int_to_ptr.vmem [resolvable:$true] %s19_s21 }
   0x6   :  { %p1831_p1 = scmp.lt.u32.totalorder %s1827_s24, %s2098_s0 }
   0x8   :  { %p1833_p2 = pnand %p1831_p1, %p1828_p0 }
   0xa   :  { %1836 = shalt.err (!%p1833_p2)
}
   0xb   :  { %s1837_s4 = scalar_lea.vmem %s20_s21, 16384  ;;  %p1842_p4 = scmp.lt.s32.totalorder %s20_s21, %s20_s21 }
   0xc   :  { %p1838_p3 = scmp.ne.s32.totalorder %s20_s21, %s1837_s4  ;;  %p1843_p5 = scmp.lt.s32.totalorder %s1837_s4, %s1837_s4 }
   0xe   :  { %p1844_p6 = por %p1843_p5, %p1842_p4 }
  0x10   :  { %p1845_p7 = pnand %p1844_p6, %p1838_p3 }
  0x12   :  { %1848 = shalt.err (!%p1845_p7)
}
  0x13   :  { %s1876_s29 = smov 1024   ;;  %s1877_s30 = smov 64  }
  0x14   :  { %25 = dma.hbm_to_vmem [thread:$0]  %s2098_s0, 16384, %s20_s21, [#allocation4], %s1876_s29, %s1876_s29, %s1877_s30  }
  0x15   :  { %s1878_s8 = smov [#allocation5]   ;;  %s1849_s12 = scalar_lea.hbm %s2099_s1, 32768 }
  0x16   :  { %s31_s9 = sshll.u32 %s1878_s8, 4  ;;  %p1850_p8 = scmp.ne.s32.totalorder %s2099_s1, %s1849_s12  ;;  %s32_s9 = int_to_ptr.vmem [resolvable:$true] %s31_s9 }
  0x17   :  { %p1853_p9 = scmp.lt.u32.totalorder %s1849_s12, %s2099_s1 }
  0x19   :  { %p1855_p10 = pnand %p1853_p9, %p1850_p8 }
  0x1b   :  { %1858 = shalt.err (!%p1855_p10)
}
  0x1c   :  { %s1859_s17 = scalar_lea.vmem %s32_s9, 32768  ;;  %p1864_p12 = scmp.lt.s32.totalorder %s32_s9, %s32_s9 }
  0x1d   :  { %p1860_p11 = scmp.ne.s32.totalorder %s32_s9, %s1859_s17  ;;  %p1865_p13 = scmp.lt.s32.totalorder %s1859_s17, %s1859_s17 }
  0x1f   :  { %p1866_p0 = por %p1865_p13, %p1864_p12 }
  0x21   :  { %p1867_p1 = pnand %p1866_p0, %p1860_p11 }
  0x23   :  { %1870 = shalt.err (!%p1867_p1)
}
  0x24   :  { %s1879_s0 = smov 256   ;;  %s1880_s18 = smov 16  }
  0x25   :  { %37 = dma.hbm_to_vmem [thread:$0]  %s2099_s1, 32768, %s32_s9, [#allocation6], %s1879_s0, %s1879_s0, %s1880_s18  }
  0x26   :  { %1871 = dma.done.wait [#allocation4], 16384  }
  0x27   :  { %1872 = vsyncadd [#allocation4], 4294950912 }
  0x28   :  { %1873 = dma.done.wait [#allocation6], 32768  }
  0x29   :  { %1874 = vsyncadd [#allocation6], 4294934528  ;;  %v179_v1 = vld [vmem:[#allocation5 + $0x8] sm:$0xff]  ;;  %v181_v2 = vld [vmem:[#allocation5 + $0x18] sm:$0xff]  ;;  %vm1333_vm0 = vcmask 7168  }
  0x2a   :  { %v307_v3 = vld [vmem:[#allocation5 + $0x408] sm:$0xff]  ;;  %v1373_v4 = vpack.c.bf16 %v181_v2, %v179_v1  ;;  %v309_v5 = vld [vmem:[#allocation5 + $0x418] sm:$0xff]  ;;  %v178_v6 = vld [vmem:[#allocation5] sm:$0xff] }
  0x2b   :  { %v180_v7 = vld [vmem:[#allocation5 + $0x10] sm:$0xff]  ;;  %v1501_v8 = vpack.c.bf16 %v309_v5, %v307_v3  ;;  %v306_v10 = vld [vmem:[#allocation5 + $0x400] sm:$0xff]  ;;  %v183_v12 = vld [vmem:[#allocation5 + $0x28] sm:$0xff] }
  0x2c   :  { %v1375_v9 = vpack.c.bf16 %v180_v7, %v178_v6  ;;  %v308_v11 = vld [vmem:[#allocation5 + $0x410] sm:$0xff]  ;;  %1374 = vmatprep.subr.bf16.mxu1 %v1373_v4  ;;  %v185_v14 = vld [vmem:[#allocation5 + $0x38] sm:$0xff]  ;;  %v311_v15 = vld [vmem:[#allocation5 + $0x428] sm:$0xff] }
  0x2d   :  { %v1503_v13 = vpack.c.bf16 %v308_v11, %v306_v10  ;;  %v313_v16 = vld [vmem:[#allocation5 + $0x438] sm:$0xff]  ;;  %1502 = vmatprep.subr.bf16.mxu0 %v1501_v8  ;;  %v1377_v17 = vpack.c.bf16 %v185_v14, %v183_v12  ;;  %v182_v19 = vld [vmem:[#allocation5 + $0x20] sm:$0xff]  ;;  %v184_v20 = vld [vmem:[#allocation5 + $0x30] sm:$0xff] }
  0x2e   :  { %1376 = vmatpush1.bf16.msra.mxu1 %v1375_v9  ;;  %v1505_v18 = vpack.c.bf16 %v313_v16, %v311_v15  ;;  %v310_v21 = vld [vmem:[#allocation5 + $0x420] sm:$0xff]  ;;  %v1379_v22 = vpack.c.bf16 %v184_v20, %v182_v19  ;;  %v312_v23 = vld [vmem:[#allocation5 + $0x430] sm:$0xff]  ;;  %v187_v24 = vld [vmem:[#allocation5 + $0x48] sm:$0xff] }
  0x2f   :  { %1504 = vmatpush1.bf16.msra.mxu0 %v1503_v13  ;;  %v189_v25 = vld [vmem:[#allocation5 + $0x58] sm:$0xff]  ;;  %1378 = vmatprep.subr.bf16.mxu1 %v1377_v17  ;;  %v1507_v26 = vpack.c.bf16 %v312_v23, %v310_v21  ;;  %v315_v28 = vld [vmem:[#allocation5 + $0x448] sm:$0xff]  ;;  %v186_v30 = vld [vmem:[#allocation5 + $0x40] sm:$0xff] }
  0x30   :  { %1506 = vmatprep.subr.bf16.mxu0 %v1505_v18  ;;  %v1381_v27 = vpack.c.bf16 %v189_v25, %v187_v24  ;;  %v317_v29 = vld [vmem:[#allocation5 + $0x458] sm:$0xff]  ;;  %v188_v32 = vld [vmem:[#allocation5 + $0x50] sm:$0xff]  ;;  %v314_v33 = vld [vmem:[#allocation5 + $0x440] sm:$0xff] }
  0x31   :  { %v1509_v31 = vpack.c.bf16 %v317_v29, %v315_v28  ;;  %v316_v34 = vld [vmem:[#allocation5 + $0x450] sm:$0xff]  ;;  %v1383_v35 = vpack.c.bf16 %v188_v32, %v186_v30  ;;  %v191_v36 = vld [vmem:[#allocation5 + $0x68] sm:$0xff]  ;;  %v193_v37 = vld [vmem:[#allocation5 + $0x78] sm:$0xff] }
  0x32   :  { %1380 = vmatpush1.bf16.msra.mxu1 %v1379_v22  ;;  %v319_v38 = vld [vmem:[#allocation5 + $0x468] sm:$0xff]  ;;  %v1511_v39 = vpack.c.bf16 %v316_v34, %v314_v33  ;;  %v1385_v40 = vpack.c.bf16 %v193_v37, %v191_v36  ;;  %v321_v41 = vld [vmem:[#allocation5 + $0x478] sm:$0xff]  ;;  %v190_v42 = vld [vmem:[#allocation5 + $0x60] sm:$0xff] }
  0x33   :  { %1508 = vmatpush1.bf16.msra.mxu0 %v1507_v26  ;;  %1382 = vmatprep.subr.bf16.mxu1 %v1381_v27  ;;  %v192_v43 = vld [vmem:[#allocation5 + $0x70] sm:$0xff]  ;;  %v1513_v44 = vpack.c.bf16 %v321_v41, %v319_v38  ;;  %v318_v45 = vld [vmem:[#allocation5 + $0x460] sm:$0xff]  ;;  %v195_v47 = vld [vmem:[#allocation5 + $0x88] sm:$0xff] }
  0x34   :  { %1510 = vmatprep.subr.bf16.mxu0 %v1509_v31  ;;  %v320_v46 = vld [vmem:[#allocation5 + $0x470] sm:$0xff]  ;;  %v197_v48 = vld [vmem:[#allocation5 + $0x98] sm:$0xff]  ;;  %v323_v49 = vld [vmem:[#allocation5 + $0x488] sm:$0xff]  ;;  %v1387_v51 = vpack.c.bf16 %v192_v43, %v190_v42 }
  0x35   :  { %v325_v50 = vld [vmem:[#allocation5 + $0x498] sm:$0xff]  ;;  %v1515_v52 = vpack.c.bf16 %v320_v46, %v318_v45  ;;  %v1389_v53 = vpack.c.bf16 %v197_v48, %v195_v47  ;;  %v194_v54 = vld [vmem:[#allocation5 + $0x80] sm:$0xff]  ;;  %v196_v55 = vld [vmem:[#allocation5 + $0x90] sm:$0xff] }
  0x36   :  { %1384 = vmatpush1.bf16.msra.mxu1 %v1383_v35  ;;  %v322_v56 = vld [vmem:[#allocation5 + $0x480] sm:$0xff]  ;;  %v1517_v57 = vpack.c.bf16 %v325_v50, %v323_v49  ;;  %v324_v58 = vld [vmem:[#allocation5 + $0x490] sm:$0xff]  ;;  %v199_v59 = vld [vmem:[#allocation5 + $0xa8] sm:$0xff]  ;;  %v1391_v63 = vpack.c.bf16 %v196_v55, %v194_v54 }
  0x37   :  { %1512 = vmatpush1.bf16.msra.mxu0 %v1511_v39  ;;  %1386 = vmatprep.subr.bf16.mxu1 %v1385_v40  ;;  %v201_v60 = vld [vmem:[#allocation5 + $0xb8] sm:$0xff]  ;;  %v327_v61 = vld [vmem:[#allocation5 + $0x4a8] sm:$0xff]  ;;  %v1519_v0 = vpack.c.bf16 %v324_v58, %v322_v56  ;;  %v198_v2 = vld [vmem:[#allocation5 + $0xa0] sm:$0xff] }
  0x38   :  { %1514 = vmatprep.subr.bf16.mxu0 %v1513_v44  ;;  %v329_v62 = vld [vmem:[#allocation5 + $0x4b8] sm:$0xff]  ;;  %v1393_v1 = vpack.c.bf16 %v201_v60, %v199_v59  ;;  %v200_v3 = vld [vmem:[#allocation5 + $0xb0] sm:$0xff]  ;;  %v326_v4 = vld [vmem:[#allocation5 + $0x4a0] sm:$0xff] }
  0x39   :  { %v1521_v5 = vpack.c.bf16 %v329_v62, %v327_v61  ;;  %v328_v6 = vld [vmem:[#allocation5 + $0x4b0] sm:$0xff]  ;;  %v203_v7 = vld [vmem:[#allocation5 + $0xc8] sm:$0xff]  ;;  %v205_v8 = vld [vmem:[#allocation5 + $0xd8] sm:$0xff]  ;;  %v1395_v11 = vpack.c.bf16 %v200_v3, %v198_v2 }
  0x3a   :  { %1388 = vmatpush1.bf16.msra.mxu1 %v1387_v51  ;;  %v331_v9 = vld [vmem:[#allocation5 + $0x4c8] sm:$0xff]  ;;  %v333_v10 = vld [vmem:[#allocation5 + $0x4d8] sm:$0xff]  ;;  %v1523_v12 = vpack.c.bf16 %v328_v6, %v326_v4  ;;  %v1397_v13 = vpack.c.bf16 %v205_v8, %v203_v7  ;;  %v202_v14 = vld [vmem:[#allocation5 + $0xc0] sm:$0xff] }
  0x3b   :  { %1516 = vmatpush1.bf16.msra.mxu0 %v1515_v52  ;;  %1390 = vmatprep.subr.bf16.mxu1 %v1389_v53  ;;  %v204_v15 = vld [vmem:[#allocation5 + $0xd0] sm:$0xff]  ;;  %v330_v16 = vld [vmem:[#allocation5 + $0x4c0] sm:$0xff]  ;;  %v1525_v17 = vpack.c.bf16 %v333_v10, %v331_v9  ;;  %v207_v19 = vld [vmem:[#allocation5 + $0xe8] sm:$0xff] }
  0x3c   :  { %1518 = vmatprep.subr.bf16.mxu0 %v1517_v57  ;;  %v332_v18 = vld [vmem:[#allocation5 + $0x4d0] sm:$0xff]  ;;  %v209_v20 = vld [vmem:[#allocation5 + $0xf8] sm:$0xff]  ;;  %v335_v21 = vld [vmem:[#allocation5 + $0x4e8] sm:$0xff]  ;;  %v1399_v23 = vpack.c.bf16 %v204_v15, %v202_v14 }
  0x3d   :  { %v337_v22 = vld [vmem:[#allocation5 + $0x4f8] sm:$0xff]  ;;  %v1527_v24 = vpack.c.bf16 %v332_v18, %v330_v16  ;;  %v1401_v25 = vpack.c.bf16 %v209_v20, %v207_v19  ;;  %v206_v26 = vld [vmem:[#allocation5 + $0xe0] sm:$0xff]  ;;  %v208_v27 = vld [vmem:[#allocation5 + $0xf0] sm:$0xff] }
  0x3e   :  { %1392 = vmatpush1.bf16.msra.mxu1 %v1391_v63  ;;  %v334_v28 = vld [vmem:[#allocation5 + $0x4e0] sm:$0xff]  ;;  %v1529_v29 = vpack.c.bf16 %v337_v22, %v335_v21  ;;  %v336_v30 = vld [vmem:[#allocation5 + $0x4f0] sm:$0xff]  ;;  %v211_v31 = vld [vmem:[#allocation5 + $0x108] sm:$0xff]  ;;  %v1403_v35 = vpack.c.bf16 %v208_v27, %v206_v26 }
  0x3f   :  { %1520 = vmatpush1.bf16.msra.mxu0 %v1519_v0  ;;  %1394 = vmatprep.subr.bf16.mxu1 %v1393_v1  ;;  %v213_v32 = vld [vmem:[#allocation5 + $0x118] sm:$0xff]  ;;  %v339_v33 = vld [vmem:[#allocation5 + $0x508] sm:$0xff]  ;;  %v1531_v36 = vpack.c.bf16 %v336_v30, %v334_v28  ;;  %v210_v38 = vld [vmem:[#allocation5 + $0x100] sm:$0xff] }
  0x40   :  { %1522 = vmatprep.subr.bf16.mxu0 %v1521_v5  ;;  %v341_v34 = vld [vmem:[#allocation5 + $0x518] sm:$0xff]  ;;  %v1405_v37 = vpack.c.bf16 %v213_v32, %v211_v31  ;;  %v212_v39 = vld [vmem:[#allocation5 + $0x110] sm:$0xff]  ;;  %v338_v40 = vld [vmem:[#allocation5 + $0x500] sm:$0xff] }
  0x41   :  { %v1533_v41 = vpack.c.bf16 %v341_v34, %v339_v33  ;;  %v340_v42 = vld [vmem:[#allocation5 + $0x510] sm:$0xff]  ;;  %v215_v43 = vld [vmem:[#allocation5 + $0x128] sm:$0xff]  ;;  %v217_v44 = vld [vmem:[#allocation5 + $0x138] sm:$0xff]  ;;  %v1407_v47 = vpack.c.bf16 %v212_v39, %v210_v38 }
  0x42   :  { %1396 = vmatpush1.bf16.msra.mxu1 %v1395_v11  ;;  %v343_v45 = vld [vmem:[#allocation5 + $0x528] sm:$0xff]  ;;  %v345_v46 = vld [vmem:[#allocation5 + $0x538] sm:$0xff]  ;;  %v1535_v48 = vpack.c.bf16 %v340_v42, %v338_v40  ;;  %v1409_v49 = vpack.c.bf16 %v217_v44, %v215_v43  ;;  %v214_v50 = vld [vmem:[#allocation5 + $0x120] sm:$0xff] }
  0x43   :  { %1524 = vmatpush1.bf16.msra.mxu0 %v1523_v12  ;;  %1398 = vmatprep.subr.bf16.mxu1 %v1397_v13  ;;  %v216_v51 = vld [vmem:[#allocation5 + $0x130] sm:$0xff]  ;;  %v342_v52 = vld [vmem:[#allocation5 + $0x520] sm:$0xff]  ;;  %v1537_v53 = vpack.c.bf16 %v345_v46, %v343_v45  ;;  %v219_v55 = vld [vmem:[#allocation5 + $0x148] sm:$0xff] }
  0x44   :  { %1526 = vmatprep.subr.bf16.mxu0 %v1525_v17  ;;  %v344_v54 = vld [vmem:[#allocation5 + $0x530] sm:$0xff]  ;;  %v221_v56 = vld [vmem:[#allocation5 + $0x158] sm:$0xff]  ;;  %v347_v57 = vld [vmem:[#allocation5 + $0x548] sm:$0xff]  ;;  %v1411_v59 = vpack.c.bf16 %v216_v51, %v214_v50 }
  0x45   :  { %v349_v58 = vld [vmem:[#allocation5 + $0x558] sm:$0xff]  ;;  %v1539_v60 = vpack.c.bf16 %v344_v54, %v342_v52  ;;  %v1413_v61 = vpack.c.bf16 %v221_v56, %v219_v55  ;;  %v218_v62 = vld [vmem:[#allocation5 + $0x140] sm:$0xff]  ;;  %v220_v63 = vld [vmem:[#allocation5 + $0x150] sm:$0xff] }
  0x46   :  { %1400 = vmatpush1.bf16.msra.mxu1 %v1399_v23  ;;  %v346_v0 = vld [vmem:[#allocation5 + $0x540] sm:$0xff]  ;;  %v1541_v1 = vpack.c.bf16 %v349_v58, %v347_v57  ;;  %v348_v2 = vld [vmem:[#allocation5 + $0x550] sm:$0xff]  ;;  %v223_v3 = vld [vmem:[#allocation5 + $0x168] sm:$0xff]  ;;  %v1415_v7 = vpack.c.bf16 %v220_v63, %v218_v62 }
  0x47   :  { %1528 = vmatpush1.bf16.msra.mxu0 %v1527_v24  ;;  %1402 = vmatprep.subr.bf16.mxu1 %v1401_v25  ;;  %v225_v4 = vld [vmem:[#allocation5 + $0x178] sm:$0xff]  ;;  %v351_v5 = vld [vmem:[#allocation5 + $0x568] sm:$0xff]  ;;  %v222_v8 = vld [vmem:[#allocation5 + $0x160] sm:$0xff]  ;;  %v1543_v9 = vpack.c.bf16 %v348_v2, %v346_v0 }
  0x48   :  { %1530 = vmatprep.subr.bf16.mxu0 %v1529_v29  ;;  %v353_v6 = vld [vmem:[#allocation5 + $0x578] sm:$0xff]  ;;  %v1417_v10 = vpack.c.bf16 %v225_v4, %v223_v3  ;;  %v224_v11 = vld [vmem:[#allocation5 + $0x170] sm:$0xff]  ;;  %v350_v12 = vld [vmem:[#allocation5 + $0x560] sm:$0xff] }
  0x49   :  { %v352_v13 = vld [vmem:[#allocation5 + $0x570] sm:$0xff]  ;;  %v1545_v14 = vpack.c.bf16 %v353_v6, %v351_v5  ;;  %v227_v15 = vld [vmem:[#allocation5 + $0x188] sm:$0xff]  ;;  %v229_v16 = vld [vmem:[#allocation5 + $0x198] sm:$0xff]  ;;  %v1419_v21 = vpack.c.bf16 %v224_v11, %v222_v8 }
  0x4a   :  { %1404 = vmatpush1.bf16.msra.mxu1 %v1403_v35  ;;  %v51_v17 = vld [vmem:[#allocation3 + $0x8] sm:$0xff]  ;;  %v357_v19 = vld [vmem:[#allocation5 + $0x598] sm:$0xff]  ;;  %v1547_v22 = vpack.c.bf16 %v352_v13, %v350_v12  ;;  %v1421_v23 = vpack.c.bf16 %v229_v16, %v227_v15  ;;  %v226_v24 = vld [vmem:[#allocation5 + $0x180] sm:$0xff] }
  0x4b   :  { %1532 = vmatpush1.bf16.msra.mxu0 %v1531_v36  ;;  %1406 = vmatprep.subr.bf16.mxu1 %v1405_v37  ;;  %v355_v18 = vld [vmem:[#allocation5 + $0x588] sm:$0xff]  ;;  %v228_v25 = vld [vmem:[#allocation5 + $0x190] sm:$0xff]  ;;  %v354_v26 = vld [vmem:[#allocation5 + $0x580] sm:$0xff] }
  0x4c   :  { %1534 = vmatprep.subr.bf16.mxu0 %v1533_v41  ;;  %510 = vmatprep.mubr.f32.mxu1 %v51_v17  ;;  %v55_v20 = vld [vmem:[#allocation3 + $0x28] sm:$0xff]  ;;  %v1549_v27 = vpack.c.bf16 %v357_v19, %v355_v18  ;;  %v356_v28 = vld [vmem:[#allocation5 + $0x590] sm:$0xff]  ;;  %v233_v30 = vld [vmem:[#allocation5 + $0x1b8] sm:$0xff]  ;;  %v1423_v33 = vpack.c.bf16 %v228_v25, %v226_v24 }
  0x4d   :  { %832 = vmatprep.mubr.f32.mxu0 %v55_v20  ;;  %v231_v29 = vld [vmem:[#allocation5 + $0x1a8] sm:$0xff]  ;;  %v361_v32 = vld [vmem:[#allocation5 + $0x5b8] sm:$0xff]  ;;  %v1551_v34 = vpack.c.bf16 %v356_v28, %v354_v26  ;;  %v230_v36 = vld [vmem:[#allocation5 + $0x1a0] sm:$0xff] }
  0x4e   :  { %1408 = vmatpush1.bf16.msra.mxu1 %v1407_v47  ;;  %v359_v31 = vld [vmem:[#allocation5 + $0x5a8] sm:$0xff]  ;;  %v1425_v35 = vpack.c.bf16 %v233_v30, %v231_v29  ;;  %v232_v37 = vld [vmem:[#allocation5 + $0x1b0] sm:$0xff]  ;;  %v358_v38 = vld [vmem:[#allocation5 + $0x5a0] sm:$0xff] }
  0x4f   :  { %1536 = vmatpush1.bf16.msra.mxu0 %v1535_v48  ;;  %1410 = vmatprep.subr.bf16.mxu1 %v1409_v49  ;;  %v1553_v39 = vpack.c.bf16 %v361_v32, %v359_v31  ;;  %v360_v40 = vld [vmem:[#allocation5 + $0x5b0] sm:$0xff]  ;;  %v235_v41 = vld [vmem:[#allocation5 + $0x1c8] sm:$0xff]  ;;  %v237_v42 = vld [vmem:[#allocation5 + $0x1d8] sm:$0xff]  ;;  %v1427_v45 = vpack.c.bf16 %v232_v37, %v230_v36 }
  0x50   :  { %1538 = vmatprep.subr.bf16.mxu0 %v1537_v53  ;;  %v363_v43 = vld [vmem:[#allocation5 + $0x5c8] sm:$0xff]  ;;  %v365_v44 = vld [vmem:[#allocation5 + $0x5d8] sm:$0xff]  ;;  %v1555_v46 = vpack.c.bf16 %v360_v40, %v358_v38  ;;  %v1429_v47 = vpack.c.bf16 %v237_v42, %v235_v41  ;;  %v234_v48 = vld [vmem:[#allocation5 + $0x1c0] sm:$0xff] }
  0x51   :  { %v236_v49 = vld [vmem:[#allocation5 + $0x1d0] sm:$0xff]  ;;  %v362_v50 = vld [vmem:[#allocation5 + $0x5c0] sm:$0xff]  ;;  %v1557_v51 = vpack.c.bf16 %v365_v44, %v363_v43  ;;  %v239_v53 = vld [vmem:[#allocation5 + $0x1e8] sm:$0xff] }
  0x52   :  { %1412 = vmatpush1.bf16.msra.mxu1 %v1411_v59  ;;  %v364_v52 = vld [vmem:[#allocation5 + $0x5d0] sm:$0xff]  ;;  %v241_v54 = vld [vmem:[#allocation5 + $0x1f8] sm:$0xff]  ;;  %v367_v55 = vld [vmem:[#allocation5 + $0x5e8] sm:$0xff]  ;;  %v1431_v57 = vpack.c.bf16 %v236_v49, %v234_v48 }
  0x53   :  { %1540 = vmatpush1.bf16.msra.mxu0 %v1539_v60  ;;  %1414 = vmatprep.subr.bf16.mxu1 %v1413_v61  ;;  %v369_v56 = vld [vmem:[#allocation5 + $0x5f8] sm:$0xff]  ;;  %v1559_v58 = vpack.c.bf16 %v364_v52, %v362_v50  ;;  %v1433_v59 = vpack.c.bf16 %v241_v54, %v239_v53  ;;  %v238_v60 = vld [vmem:[#allocation5 + $0x1e0] sm:$0xff]  ;;  %v240_v61 = vld [vmem:[#allocation5 + $0x1f0] sm:$0xff] }
  0x54   :  { %1542 = vmatprep.subr.bf16.mxu0 %v1541_v1  ;;  %v366_v62 = vld [vmem:[#allocation5 + $0x5e0] sm:$0xff]  ;;  %v1561_v63 = vpack.c.bf16 %v369_v56, %v367_v55  ;;  %v368_v0 = vld [vmem:[#allocation5 + $0x5f0] sm:$0xff]  ;;  %v243_v1 = vld [vmem:[#allocation5 + $0x208] sm:$0xff]  ;;  %v1435_v5 = vpack.c.bf16 %v240_v61, %v238_v60 }
  0x55   :  { %v245_v2 = vld [vmem:[#allocation5 + $0x218] sm:$0xff]  ;;  %v371_v3 = vld [vmem:[#allocation5 + $0x608] sm:$0xff]  ;;  %v1563_v6 = vpack.c.bf16 %v368_v0, %v366_v62  ;;  %v242_v8 = vld [vmem:[#allocation5 + $0x200] sm:$0xff] }
  0x56   :  { %1416 = vmatpush1.bf16.msra.mxu1 %v1415_v7  ;;  %v373_v4 = vld [vmem:[#allocation5 + $0x618] sm:$0xff]  ;;  %v1437_v7 = vpack.c.bf16 %v245_v2, %v243_v1  ;;  %v370_v11 = vld [vmem:[#allocation5 + $0x600] sm:$0xff]  ;;  %v372_v12 = vld [vmem:[#allocation5 + $0x610] sm:$0xff] }
  0x57   :  { %1544 = vmatpush1.bf16.msra.mxu0 %v1543_v9  ;;  %1418 = vmatprep.subr.bf16.mxu1 %v1417_v10  ;;  %v244_v9 = vld [vmem:[#allocation5 + $0x210] sm:$0xff]  ;;  %v1565_v10 = vpack.c.bf16 %v373_v4, %v371_v3  ;;  %v247_v13 = vld [vmem:[#allocation5 + $0x228] sm:$0xff]  ;;  %v50_v15 = vld [vmem:[#allocation3] sm:$0xff]  ;;  %v1567_v20 = vpack.c.bf16 %v372_v12, %v370_v11 }
  0x58   :  { %1546 = vmatprep.subr.bf16.mxu0 %v1545_v14  ;;  %v249_v14 = vld [vmem:[#allocation5 + $0x238] sm:$0xff]  ;;  %v1439_v16 = vpack.c.bf16 %v244_v9, %v242_v8  ;;  %v375_v17 = vld [vmem:[#allocation5 + $0x628] sm:$0xff]  ;;  %v54_v19 = vld [vmem:[#allocation3 + $0x20] sm:$0xff] }
  0x59   :  { %v377_v18 = vld [vmem:[#allocation5 + $0x638] sm:$0xff]  ;;  %v1441_v24 = vpack.c.bf16 %v249_v14, %v247_v13  ;;  %v374_v25 = vld [vmem:[#allocation5 + $0x620] sm:$0xff]  ;;  %v376_v26 = vld [vmem:[#allocation5 + $0x630] sm:$0xff] }
  0x5a   :  { %1420 = vmatpush1.bf16.msra.mxu1 %v1419_v21  ;;  %v246_v21 = vld [vmem:[#allocation5 + $0x220] sm:$0xff]  ;;  %v1569_v28 = vpack.c.bf16 %v377_v18, %v375_v17  ;;  %v251_v29 = vld [vmem:[#allocation5 + $0x248] sm:$0xff]  ;;  %v253_v30 = vld [vmem:[#allocation5 + $0x258] sm:$0xff]  ;;  %v1571_v36 = vpack.c.bf16 %v376_v26, %v374_v25 }
  0x5b   :  { %1548 = vmatpush1.bf16.msra.mxu0 %v1547_v22  ;;  %1422 = vmatprep.subr.bf16.mxu1 %v1421_v23  ;;  %v248_v22 = vld [vmem:[#allocation5 + $0x230] sm:$0xff]  ;;  %v59_v23 = vld [vmem:[#allocation3 + $0x48] sm:$0xff]  ;;  %v58_v31 = vld [vmem:[#allocation3 + $0x40] sm:$0xff]  ;;  %v1445_v40 = vpack.c.bf16 %v253_v30, %v251_v29 }
  0x5c   :  { %1550 = vmatprep.subr.bf16.mxu0 %v1549_v27  ;;  %v63_v27 = vld [vmem:[#allocation3 + $0x68] sm:$0xff]  ;;  %v1443_v32 = vpack.c.bf16 %v248_v22, %v246_v21  ;;  %v250_v37 = vld [vmem:[#allocation5 + $0x240] sm:$0xff]  ;;  %v252_v38 = vld [vmem:[#allocation5 + $0x250] sm:$0xff] }
  0x5d   :  { %v378_v41 = vld [vmem:[#allocation5 + $0x640] sm:$0xff]  ;;  %v380_v42 = vld [vmem:[#allocation5 + $0x650] sm:$0xff]  ;;  %v71_v43 = vld [vmem:[#allocation3 + $0xa8] sm:$0xff]  ;;  %v1447_v48 = vpack.c.bf16 %v252_v38, %v250_v37 }
  0x5e   :  { %1424 = vmatpush1.bf16.msra.mxu1 %v1423_v33  ;;  %v379_v33 = vld [vmem:[#allocation5 + $0x648] sm:$0xff]  ;;  %v385_v50 = vld [vmem:[#allocation5 + $0x678] sm:$0xff]  ;;  %v1575_v52 = vpack.c.bf16 %v380_v42, %v378_v41  ;;  %v254_v53 = vld [vmem:[#allocation5 + $0x260] sm:$0xff] }
  0x5f   :  { %1552 = vmatpush1.bf16.msra.mxu0 %v1551_v34  ;;  %1426 = vmatprep.subr.bf16.mxu1 %v1425_v35  ;;  %v381_v34 = vld [vmem:[#allocation5 + $0x658] sm:$0xff]  ;;  %v62_v35 = vld [vmem:[#allocation3 + $0x60] sm:$0xff]  ;;  %v383_v49 = vld [vmem:[#allocation5 + $0x668] sm:$0xff] }
  0x60   :  { %1554 = vmatprep.subr.bf16.mxu0 %v1553_v39  ;;  %v67_v39 = vld [vmem:[#allocation3 + $0x88] sm:$0xff]  ;;  %v1573_v44 = vpack.c.bf16 %v381_v34, %v379_v33  ;;  %v256_v54 = vld [vmem:[#allocation5 + $0x270] sm:$0xff]  ;;  %v1577_v60 = vpack.c.bf16 %v385_v50, %v383_v49  ;;  %v261_v62 = vld [vmem:[#allocation5 + $0x298] sm:$0xff] }
  0x61   :  { %v75_v55 = vld [vmem:[#allocation3 + $0xc8] sm:$0xff]  ;;  %v1451_v0 = vpack.c.bf16 %v256_v54, %v254_v53  ;;  %v389_v2 = vld [vmem:[#allocation5 + $0x698] sm:$0xff]  ;;  %v78_v3 = vld [vmem:[#allocation3 + $0xe0] sm:$0xff] }
  0x62   :  { %1428 = vmatpush1.bf16.msra.mxu1 %v1427_v45  ;;  %v255_v45 = vld [vmem:[#allocation5 + $0x268] sm:$0xff]  ;;  %v386_v9 = vld [vmem:[#allocation5 + $0x680] sm:$0xff]  ;;  %v265_v14 = vld [vmem:[#allocation5 + $0x2b8] sm:$0xff] }
  0x63   :  { %1556 = vmatpush1.bf16.msra.mxu0 %v1555_v46  ;;  %1430 = vmatprep.subr.bf16.mxu1 %v1429_v47  ;;  %v257_v46 = vld [vmem:[#allocation5 + $0x278] sm:$0xff]  ;;  %v66_v47 = vld [vmem:[#allocation3 + $0x80] sm:$0xff]  ;;  %v259_v61 = vld [vmem:[#allocation5 + $0x288] sm:$0xff] }
  0x64   :  { %1558 = vmatprep.subr.bf16.mxu0 %v1557_v51  ;;  %v70_v51 = vld [vmem:[#allocation3 + $0xa0] sm:$0xff]  ;;  %v1449_v56 = vpack.c.bf16 %v257_v46, %v255_v45  ;;  %v387_v1 = vld [vmem:[#allocation5 + $0x688] sm:$0xff]  ;;  %v1453_v8 = vpack.c.bf16 %v261_v62, %v259_v61  ;;  %v393_v18 = vld [vmem:[#allocation5 + $0x6b8] sm:$0xff] }
  0x65   :  { %v87_v11 = vld [vmem:[#allocation3 + $0x128] sm:$0xff]  ;;  %v1581_v12 = vpack.c.bf16 %v389_v2, %v387_v1  ;;  %v262_v21 = vld [vmem:[#allocation5 + $0x2a0] sm:$0xff]  ;;  %v264_v22 = vld [vmem:[#allocation5 + $0x2b0] sm:$0xff] }
  0x66   :  { %1432 = vmatpush1.bf16.msra.mxu1 %v1431_v57  ;;  %v382_v57 = vld [vmem:[#allocation5 + $0x660] sm:$0xff]  ;;  %v263_v13 = vld [vmem:[#allocation5 + $0x2a8] sm:$0xff]  ;;  %v392_v26 = vld [vmem:[#allocation5 + $0x6b0] sm:$0xff] }
  0x67   :  { %1560 = vmatpush1.bf16.msra.mxu0 %v1559_v58  ;;  %1434 = vmatprep.subr.bf16.mxu1 %v1433_v59  ;;  %v384_v58 = vld [vmem:[#allocation5 + $0x670] sm:$0xff]  ;;  %v79_v59 = vld [vmem:[#allocation3 + $0xe8] sm:$0xff]  ;;  %v390_v25 = vld [vmem:[#allocation5 + $0x6a0] sm:$0xff] }
  0x68   :  { %1562 = vmatprep.subr.bf16.mxu0 %v1561_v63  ;;  %v74_v63 = vld [vmem:[#allocation3 + $0xc0] sm:$0xff]  ;;  %v1579_v4 = vpack.c.bf16 %v384_v58, %v382_v57  ;;  %v391_v17 = vld [vmem:[#allocation5 + $0x6a8] sm:$0xff]  ;;  %v269_v30 = vld [vmem:[#allocation5 + $0x2d8] sm:$0xff] }
  0x69   :  { %v267_v29 = vld [vmem:[#allocation5 + $0x2c8] sm:$0xff]  ;;  %v397_v34 = vld [vmem:[#allocation5 + $0x6d8] sm:$0xff]  ;;  %v266_v37 = vld [vmem:[#allocation5 + $0x2c0] sm:$0xff] }
  0x6a   :  { %1436 = vmatpush1.bf16.msra.mxu1 %v1435_v5  ;;  %v258_v5 = vld [vmem:[#allocation5 + $0x280] sm:$0xff]  ;;  %v395_v33 = vld [vmem:[#allocation5 + $0x6c8] sm:$0xff]  ;;  %v268_v38 = vld [vmem:[#allocation5 + $0x2d0] sm:$0xff] }
  0x6b   :  { %1564 = vmatpush1.bf16.msra.mxu0 %v1563_v6  ;;  %1438 = vmatprep.subr.bf16.mxu1 %v1437_v7  ;;  %v260_v6 = vld [vmem:[#allocation5 + $0x290] sm:$0xff]  ;;  %v83_v7 = vld [vmem:[#allocation3 + $0x108] sm:$0xff]  ;;  %v394_v41 = vld [vmem:[#allocation5 + $0x6c0] sm:$0xff] }
  0x6c   :  { %1566 = vmatprep.subr.bf16.mxu0 %v1565_v10  ;;  %v388_v10 = vld [vmem:[#allocation5 + $0x690] sm:$0xff]  ;;  %v271_v45 = vld [vmem:[#allocation5 + $0x2e8] sm:$0xff]  ;;  %v273_v46 = vld [vmem:[#allocation5 + $0x2f8] sm:$0xff] }
  0x6d   :  { %511 = vmatmul.mubr.f32.vlgmr.msra.gmra.mrb[0].mxu1 %v50_v15  ;;  %v82_v15 = vld [vmem:[#allocation3 + $0x100] sm:$0xff]  ;;  %v396_v42 = vld [vmem:[#allocation5 + $0x6d0] sm:$0xff]  ;;  %v399_v49 = vld [vmem:[#allocation5 + $0x6e8] sm:$0xff] }
  0x6e   :  { %833 = vmatmul.mubr.f32.vlgmr.msra.gmra.mrb[0].mxu0 %v54_v19  ;;  %1440 = vmatpush1.bf16.msra.mxu1 %v1439_v16  ;;  %v1455_v16 = vpack.c.bf16 %v260_v6, %v258_v5  ;;  %v86_v19 = vld [vmem:[#allocation3 + $0x120] sm:$0xff]  ;;  %v401_v50 = vld [vmem:[#allocation5 + $0x6f8] sm:$0xff]  ;;  %v272_v54 = vld [vmem:[#allocation5 + $0x2f0] sm:$0xff] }
  0x6f   :  { %1568 = vmatpush1.bf16.msra.mxu0 %v1567_v20  ;;  %516 = vmatprep.mubr.f32.mxu1 %v59_v23  ;;  %v1583_v20 = vpack.c.bf16 %v388_v10, %v386_v9  ;;  %v91_v23 = vld [vmem:[#allocation3 + $0x148] sm:$0xff]  ;;  %v270_v53 = vld [vmem:[#allocation5 + $0x2e0] sm:$0xff]  ;;  %v400_v58 = vld [vmem:[#allocation5 + $0x6f0] sm:$0xff] }
  0x70   :  { %838 = vmatprep.mubr.f32.mxu0 %v63_v27  ;;  %1442 = vmatprep.subr.bf16.mxu1 %v1441_v24  ;;  %v1457_v24 = vpack.c.bf16 %v265_v14, %v263_v13  ;;  %v95_v27 = vld [vmem:[#allocation3 + $0x168] sm:$0xff]  ;;  %v398_v57 = vld [vmem:[#allocation5 + $0x6e0] sm:$0xff]  ;;  %v277_v62 = vld [vmem:[#allocation5 + $0x318] sm:$0xff] }
  0x71   :  { %517 = vmatmul.mubr.f32.gmra.mrb[2].mxu1 %v58_v31  ;;  %1570 = vmatprep.subr.bf16.mxu0 %v1569_v28  ;;  %v1585_v28 = vpack.c.bf16 %v393_v18, %v391_v17  ;;  %v90_v31 = vld [vmem:[#allocation3 + $0x140] sm:$0xff]  ;;  %v275_v61 = vld [vmem:[#allocation5 + $0x308] sm:$0xff]  ;;  %v405_v2 = vld [vmem:[#allocation5 + $0x718] sm:$0xff] }
  0x72   :  { %839 = vmatmul.mubr.f32.gmra.mrb[2].mxu0 %v62_v35  ;;  %1444 = vmatpush1.bf16.msra.mxu1 %v1443_v32  ;;  %v1459_v32 = vpack.c.bf16 %v264_v22, %v262_v21  ;;  %v94_v35 = vld [vmem:[#allocation3 + $0x160] sm:$0xff]  ;;  %v403_v1 = vld [vmem:[#allocation5 + $0x708] sm:$0xff]  ;;  %v276_v6 = vld [vmem:[#allocation5 + $0x310] sm:$0xff] }
  0x73   :  { %1572 = vmatpush1.bf16.msra.mxu0 %v1571_v36  ;;  %522 = vmatprep.mubr.f32.mxu1 %v67_v39  ;;  %v1587_v36 = vpack.c.bf16 %v392_v26, %v390_v25  ;;  %v99_v39 = vld [vmem:[#allocation3 + $0x188] sm:$0xff]  ;;  %v274_v5 = vld [vmem:[#allocation5 + $0x300] sm:$0xff]  ;;  %v404_v10 = vld [vmem:[#allocation5 + $0x710] sm:$0xff] }
  0x74   :  { %844 = vmatprep.mubr.f32.mxu0 %v71_v43  ;;  %1446 = vmatprep.subr.bf16.mxu1 %v1445_v40  ;;  %v1461_v40 = vpack.c.bf16 %v269_v30, %v267_v29  ;;  %v103_v43 = vld [vmem:[#allocation3 + $0x1a8] sm:$0xff]  ;;  %v402_v9 = vld [vmem:[#allocation5 + $0x700] sm:$0xff]  ;;  %v281_v14 = vld [vmem:[#allocation5 + $0x338] sm:$0xff] }
  0x75   :  { %523 = vmatmul.mubr.f32.gmra.mrb[4].mxu1 %v66_v47  ;;  %1574 = vmatprep.subr.bf16.mxu0 %v1573_v44  ;;  %v1589_v44 = vpack.c.bf16 %v397_v34, %v395_v33  ;;  %v98_v47 = vld [vmem:[#allocation3 + $0x180] sm:$0xff]  ;;  %v279_v13 = vld [vmem:[#allocation5 + $0x328] sm:$0xff]  ;;  %v409_v18 = vld [vmem:[#allocation5 + $0x738] sm:$0xff] }
  0x76   :  { %845 = vmatmul.mubr.f32.gmra.mrb[4].mxu0 %v70_v51  ;;  %1448 = vmatpush1.bf16.msra.mxu1 %v1447_v48  ;;  %v1463_v48 = vpack.c.bf16 %v268_v38, %v266_v37  ;;  %v102_v51 = vld [vmem:[#allocation3 + $0x1a0] sm:$0xff]  ;;  %v407_v17 = vld [vmem:[#allocation5 + $0x728] sm:$0xff]  ;;  %v280_v22 = vld [vmem:[#allocation5 + $0x330] sm:$0xff] }
  0x77   :  { %1576 = vmatpush1.bf16.msra.mxu0 %v1575_v52  ;;  %528 = vmatprep.mubr.f32.mxu1 %v75_v55  ;;  %v1591_v52 = vpack.c.bf16 %v396_v42, %v394_v41  ;;  %v107_v55 = vld [vmem:[#allocation3 + $0x1c8] sm:$0xff]  ;;  %v278_v21 = vld [vmem:[#allocation5 + $0x320] sm:$0xff]  ;;  %v408_v26 = vld [vmem:[#allocation5 + $0x730] sm:$0xff] }
  0x78   :  { %850 = vmatprep.mubr.f32.mxu0 %v79_v59  ;;  %1450 = vmatprep.subr.bf16.mxu1 %v1449_v56  ;;  %v1465_v56 = vpack.c.bf16 %v273_v46, %v271_v45  ;;  %v111_v59 = vld [vmem:[#allocation3 + $0x1e8] sm:$0xff]  ;;  %v406_v25 = vld [vmem:[#allocation5 + $0x720] sm:$0xff]  ;;  %v285_v30 = vld [vmem:[#allocation5 + $0x358] sm:$0xff] }
  0x79   :  { %529 = vmatmul.mubr.f32.gmra.mrb[6].mxu1 %v74_v63  ;;  %1578 = vmatprep.subr.bf16.mxu0 %v1577_v60  ;;  %v1593_v60 = vpack.c.bf16 %v401_v50, %v399_v49  ;;  %v106_v63 = vld [vmem:[#allocation3 + $0x1c0] sm:$0xff]  ;;  %v283_v29 = vld [vmem:[#allocation5 + $0x348] sm:$0xff]  ;;  %v413_v34 = vld [vmem:[#allocation5 + $0x758] sm:$0xff] }
  0x7a   :  { %851 = vmatmul.mubr.f32.gmra.mrb[6].mxu0 %v78_v3  ;;  %1452 = vmatpush1.bf16.msra.mxu1 %v1451_v0  ;;  %v1467_v0 = vpack.c.bf16 %v272_v54, %v270_v53  ;;  %v110_v3 = vld [vmem:[#allocation3 + $0x1e0] sm:$0xff]  ;;  %v411_v33 = vld [vmem:[#allocation5 + $0x748] sm:$0xff]  ;;  %v284_v38 = vld [vmem:[#allocation5 + $0x350] sm:$0xff] }
  0x7b   :  { %1580 = vmatpush1.bf16.msra.mxu0 %v1579_v4  ;;  %534 = vmatprep.mubr.f32.mxu1 %v83_v7  ;;  %v1595_v4 = vpack.c.bf16 %v400_v58, %v398_v57  ;;  %v115_v7 = vld [vmem:[#allocation3 + $0x208] sm:$0xff]  ;;  %v282_v37 = vld [vmem:[#allocation5 + $0x340] sm:$0xff]  ;;  %v412_v42 = vld [vmem:[#allocation5 + $0x750] sm:$0xff] }
  0x7c   :  { %856 = vmatprep.mubr.f32.mxu0 %v87_v11  ;;  %1454 = vmatprep.subr.bf16.mxu1 %v1453_v8  ;;  %v1469_v8 = vpack.c.bf16 %v277_v62, %v275_v61  ;;  %v119_v11 = vld [vmem:[#allocation3 + $0x228] sm:$0xff]  ;;  %v410_v41 = vld [vmem:[#allocation5 + $0x740] sm:$0xff]  ;;  %v289_v46 = vld [vmem:[#allocation5 + $0x378] sm:$0xff] }
  0x7d   :  { %535 = vmatmul.mubr.f32.gmra.mrb[8].mxu1 %v82_v15  ;;  %1582 = vmatprep.subr.bf16.mxu0 %v1581_v12  ;;  %v1597_v12 = vpack.c.bf16 %v405_v2, %v403_v1  ;;  %v114_v15 = vld [vmem:[#allocation3 + $0x200] sm:$0xff]  ;;  %v287_v45 = vld [vmem:[#allocation5 + $0x368] sm:$0xff]  ;;  %v417_v50 = vld [vmem:[#allocation5 + $0x778] sm:$0xff] }
  0x7e   :  { %857 = vmatmul.mubr.f32.gmra.mrb[8].mxu0 %v86_v19  ;;  %1456 = vmatpush1.bf16.msra.mxu1 %v1455_v16  ;;  %v1471_v16 = vpack.c.bf16 %v276_v6, %v274_v5  ;;  %v118_v19 = vld [vmem:[#allocation3 + $0x220] sm:$0xff]  ;;  %v415_v49 = vld [vmem:[#allocation5 + $0x768] sm:$0xff]  ;;  %v288_v54 = vld [vmem:[#allocation5 + $0x370] sm:$0xff] }
  0x7f   :  { %1584 = vmatpush1.bf16.msra.mxu0 %v1583_v20  ;;  %540 = vmatprep.mubr.f32.mxu1 %v91_v23  ;;  %v1599_v20 = vpack.c.bf16 %v404_v10, %v402_v9  ;;  %v123_v23 = vld [vmem:[#allocation3 + $0x248] sm:$0xff]  ;;  %v286_v53 = vld [vmem:[#allocation5 + $0x360] sm:$0xff]  ;;  %v416_v58 = vld [vmem:[#allocation5 + $0x770] sm:$0xff] }
  0x80   :  { %862 = vmatprep.mubr.f32.mxu0 %v95_v27  ;;  %1458 = vmatprep.subr.bf16.mxu1 %v1457_v24  ;;  %v1473_v24 = vpack.c.bf16 %v281_v14, %v279_v13  ;;  %v127_v27 = vld [vmem:[#allocation3 + $0x268] sm:$0xff]  ;;  %v414_v57 = vld [vmem:[#allocation5 + $0x760] sm:$0xff]  ;;  %v293_v62 = vld [vmem:[#allocation5 + $0x398] sm:$0xff] }
  0x81   :  { %541 = vmatmul.mubr.f32.gmra.mrb[10].mxu1 %v90_v31  ;;  %1586 = vmatprep.subr.bf16.mxu0 %v1585_v28  ;;  %v1601_v28 = vpack.c.bf16 %v409_v18, %v407_v17  ;;  %v122_v31 = vld [vmem:[#allocation3 + $0x240] sm:$0xff]  ;;  %v291_v61 = vld [vmem:[#allocation5 + $0x388] sm:$0xff]  ;;  %v421_v2 = vld [vmem:[#allocation5 + $0x798] sm:$0xff] }
  0x82   :  { %863 = vmatmul.mubr.f32.gmra.mrb[10].mxu0 %v94_v35  ;;  %1460 = vmatpush1.bf16.msra.mxu1 %v1459_v32  ;;  %v1475_v32 = vpack.c.bf16 %v280_v22, %v278_v21  ;;  %v126_v35 = vld [vmem:[#allocation3 + $0x260] sm:$0xff]  ;;  %v419_v1 = vld [vmem:[#allocation5 + $0x788] sm:$0xff]  ;;  %v292_v6 = vld [vmem:[#allocation5 + $0x390] sm:$0xff] }
  0x83   :  { %1588 = vmatpush1.bf16.msra.mxu0 %v1587_v36  ;;  %546 = vmatprep.mubr.f32.mxu1 %v99_v39  ;;  %v1603_v36 = vpack.c.bf16 %v408_v26, %v406_v25  ;;  %v131_v39 = vld [vmem:[#allocation3 + $0x288] sm:$0xff]  ;;  %v290_v5 = vld [vmem:[#allocation5 + $0x380] sm:$0xff]  ;;  %v420_v10 = vld [vmem:[#allocation5 + $0x790] sm:$0xff] }
  0x84   :  { %868 = vmatprep.mubr.f32.mxu0 %v103_v43  ;;  %1462 = vmatprep.subr.bf16.mxu1 %v1461_v40  ;;  %v1477_v40 = vpack.c.bf16 %v285_v30, %v283_v29  ;;  %v135_v43 = vld [vmem:[#allocation3 + $0x2a8] sm:$0xff]  ;;  %v418_v9 = vld [vmem:[#allocation5 + $0x780] sm:$0xff]  ;;  %v297_v14 = vld [vmem:[#allocation5 + $0x3b8] sm:$0xff] }
  0x85   :  { %547 = vmatmul.mubr.f32.gmra.mrb[12].mxu1 %v98_v47  ;;  %1590 = vmatprep.subr.bf16.mxu0 %v1589_v44  ;;  %v1605_v44 = vpack.c.bf16 %v413_v34, %v411_v33  ;;  %v130_v47 = vld [vmem:[#allocation3 + $0x280] sm:$0xff]  ;;  %v295_v13 = vld [vmem:[#allocation5 + $0x3a8] sm:$0xff]  ;;  %v425_v18 = vld [vmem:[#allocation5 + $0x7b8] sm:$0xff] }
  0x86   :  { %869 = vmatmul.mubr.f32.gmra.mrb[12].mxu0 %v102_v51  ;;  %1464 = vmatpush1.bf16.msra.mxu1 %v1463_v48  ;;  %v1479_v48 = vpack.c.bf16 %v284_v38, %v282_v37  ;;  %v134_v51 = vld [vmem:[#allocation3 + $0x2a0] sm:$0xff]  ;;  %v423_v17 = vld [vmem:[#allocation5 + $0x7a8] sm:$0xff]  ;;  %v296_v22 = vld [vmem:[#allocation5 + $0x3b0] sm:$0xff] }
  0x87   :  { %1592 = vmatpush1.bf16.msra.mxu0 %v1591_v52  ;;  %552 = vmatprep.mubr.f32.mxu1 %v107_v55  ;;  %v1607_v52 = vpack.c.bf16 %v412_v42, %v410_v41  ;;  %v139_v55 = vld [vmem:[#allocation3 + $0x2c8] sm:$0xff]  ;;  %v294_v21 = vld [vmem:[#allocation5 + $0x3a0] sm:$0xff]  ;;  %v424_v26 = vld [vmem:[#allocation5 + $0x7b0] sm:$0xff] }
  0x88   :  { %874 = vmatprep.mubr.f32.mxu0 %v111_v59  ;;  %1466 = vmatprep.subr.bf16.mxu1 %v1465_v56  ;;  %v1481_v56 = vpack.c.bf16 %v289_v46, %v287_v45  ;;  %v143_v59 = vld [vmem:[#allocation3 + $0x2e8] sm:$0xff]  ;;  %v422_v25 = vld [vmem:[#allocation5 + $0x7a0] sm:$0xff]  ;;  %v301_v30 = vld [vmem:[#allocation5 + $0x3d8] sm:$0xff] }
  0x89   :  { %553 = vmatmul.mubr.f32.gmra.mrb[14].mxu1 %v106_v63  ;;  %1594 = vmatprep.subr.bf16.mxu0 %v1593_v60  ;;  %v1609_v60 = vpack.c.bf16 %v417_v50, %v415_v49  ;;  %v138_v63 = vld [vmem:[#allocation3 + $0x2c0] sm:$0xff]  ;;  %v299_v29 = vld [vmem:[#allocation5 + $0x3c8] sm:$0xff]  ;;  %v429_v34 = vld [vmem:[#allocation5 + $0x7d8] sm:$0xff] }
  0x8a   :  { %875 = vmatmul.mubr.f32.gmra.mrb[14].mxu0 %v110_v3  ;;  %1468 = vmatpush1.bf16.msra.mxu1 %v1467_v0  ;;  %v1483_v0 = vpack.c.bf16 %v288_v54, %v286_v53  ;;  %v142_v3 = vld [vmem:[#allocation3 + $0x2e0] sm:$0xff]  ;;  %v427_v33 = vld [vmem:[#allocation5 + $0x7c8] sm:$0xff]  ;;  %v300_v38 = vld [vmem:[#allocation5 + $0x3d0] sm:$0xff] }
  0x8b   :  { %1596 = vmatpush1.bf16.msra.mxu0 %v1595_v4  ;;  %558 = vmatprep.mubr.f32.mxu1 %v115_v7  ;;  %v1611_v4 = vpack.c.bf16 %v416_v58, %v414_v57  ;;  %v147_v7 = vld [vmem:[#allocation3 + $0x308] sm:$0xff]  ;;  %v298_v37 = vld [vmem:[#allocation5 + $0x3c0] sm:$0xff]  ;;  %v428_v42 = vld [vmem:[#allocation5 + $0x7d0] sm:$0xff] }
  0x8c   :  { %880 = vmatprep.mubr.f32.mxu0 %v119_v11  ;;  %1470 = vmatprep.subr.bf16.mxu1 %v1469_v8  ;;  %v1485_v8 = vpack.c.bf16 %v293_v62, %v291_v61  ;;  %v151_v11 = vld [vmem:[#allocation3 + $0x328] sm:$0xff]  ;;  %v426_v41 = vld [vmem:[#allocation5 + $0x7c0] sm:$0xff]  ;;  %v305_v46 = vld [vmem:[#allocation5 + $0x3f8] sm:$0xff] }
  0x8d   :  { %559 = vmatmul.mubr.f32.gmra.mrb[16].mxu1 %v114_v15  ;;  %1598 = vmatprep.subr.bf16.mxu0 %v1597_v12  ;;  %v1613_v12 = vpack.c.bf16 %v421_v2, %v419_v1  ;;  %v146_v15 = vld [vmem:[#allocation3 + $0x300] sm:$0xff]  ;;  %v303_v45 = vld [vmem:[#allocation5 + $0x3e8] sm:$0xff]  ;;  %v433_v50 = vld [vmem:[#allocation5 + $0x7f8] sm:$0xff] }
  0x8e   :  { %881 = vmatmul.mubr.f32.gmra.mrb[16].mxu0 %v118_v19  ;;  %1472 = vmatpush1.bf16.msra.mxu1 %v1471_v16  ;;  %v1487_v16 = vpack.c.bf16 %v292_v6, %v290_v5  ;;  %v150_v19 = vld [vmem:[#allocation3 + $0x320] sm:$0xff]  ;;  %v431_v49 = vld [vmem:[#allocation5 + $0x7e8] sm:$0xff]  ;;  %v304_v54 = vld [vmem:[#allocation5 + $0x3f0] sm:$0xff] }
  0x8f   :  { %1600 = vmatpush1.bf16.msra.mxu0 %v1599_v20  ;;  %564 = vmatprep.mubr.f32.mxu1 %v123_v23  ;;  %v1615_v20 = vpack.c.bf16 %v420_v10, %v418_v9  ;;  %v155_v23 = vld [vmem:[#allocation3 + $0x348] sm:$0xff]  ;;  %v302_v53 = vld [vmem:[#allocation5 + $0x3e0] sm:$0xff]  ;;  %v432_v58 = vld [vmem:[#allocation5 + $0x7f0] sm:$0xff] }
  0x90   :  { %886 = vmatprep.mubr.f32.mxu0 %v127_v27  ;;  %1474 = vmatprep.subr.bf16.mxu1 %v1473_v24  ;;  %v1489_v24 = vpack.c.bf16 %v297_v14, %v295_v13  ;;  %v159_v27 = vld [vmem:[#allocation3 + $0x368] sm:$0xff]  ;;  %v430_v57 = vld [vmem:[#allocation5 + $0x7e0] sm:$0xff]  ;;  %v1499_v62 = vpack.c.bf16 %v304_v54, %v302_v53  ;;  %v53_v1 = vld [vmem:[#allocation3 + $0x18] sm:$0xff] }
  0x91   :  { %565 = vmatmul.mubr.f32.gmra.mrb[18].mxu1 %v122_v31  ;;  %1602 = vmatprep.subr.bf16.mxu0 %v1601_v28  ;;  %v1617_v28 = vpack.c.bf16 %v425_v18, %v423_v17  ;;  %v154_v31 = vld [vmem:[#allocation3 + $0x340] sm:$0xff]  ;;  %v57_v2 = vld [vmem:[#allocation3 + $0x38] sm:$0xff] }
  0x92   :  { %887 = vmatmul.mubr.f32.gmra.mrb[18].mxu0 %v126_v35  ;;  %1476 = vmatpush1.bf16.msra.mxu1 %v1475_v32  ;;  %v1491_v32 = vpack.c.bf16 %v296_v22, %v294_v21  ;;  %v158_v35 = vld [vmem:[#allocation3 + $0x360] sm:$0xff]  ;;  %v61_v5 = vld [vmem:[#allocation3 + $0x58] sm:$0xff] }
  0x93   :  { %1604 = vmatpush1.bf16.msra.mxu0 %v1603_v36  ;;  %570 = vmatprep.mubr.f32.mxu1 %v131_v39  ;;  %v1619_v36 = vpack.c.bf16 %v424_v26, %v422_v25  ;;  %v163_v39 = vld [vmem:[#allocation3 + $0x388] sm:$0xff]  ;;  %v170_v61 = vld [vmem:[#allocation3 + $0x3c0] sm:$0xff]  ;;  %v65_v6 = vld [vmem:[#allocation3 + $0x78] sm:$0xff] }
  0x94   :  { %892 = vmatprep.mubr.f32.mxu0 %v135_v43  ;;  %1478 = vmatprep.subr.bf16.mxu1 %v1477_v40  ;;  %v1493_v40 = vpack.c.bf16 %v301_v30, %v299_v29  ;;  %v167_v43 = vld [vmem:[#allocation3 + $0x3a8] sm:$0xff]  ;;  %v69_v9 = vld [vmem:[#allocation3 + $0x98] sm:$0xff] }
  0x95   :  { %571 = vmatmul.mubr.f32.gmra.mrb[20].mxu1 %v130_v47  ;;  %1606 = vmatprep.subr.bf16.mxu0 %v1605_v44  ;;  %v1621_v44 = vpack.c.bf16 %v429_v34, %v427_v33  ;;  %v162_v47 = vld [vmem:[#allocation3 + $0x380] sm:$0xff]  ;;  %v73_v10 = vld [vmem:[#allocation3 + $0xb8] sm:$0xff] }
  0x96   :  { %893 = vmatmul.mubr.f32.gmra.mrb[20].mxu0 %v134_v51  ;;  %1480 = vmatpush1.bf16.msra.mxu1 %v1479_v48  ;;  %v1495_v48 = vpack.c.bf16 %v300_v38, %v298_v37  ;;  %v166_v51 = vld [vmem:[#allocation3 + $0x3a0] sm:$0xff]  ;;  %v77_v13 = vld [vmem:[#allocation3 + $0xd8] sm:$0xff] }
  0x97   :  { %1608 = vmatpush1.bf16.msra.mxu0 %v1607_v52  ;;  %576 = vmatprep.mubr.f32.mxu1 %v139_v55  ;;  %v1623_v52 = vpack.c.bf16 %v428_v42, %v426_v41  ;;  %v171_v55 = vld [vmem:[#allocation3 + $0x3c8] sm:$0xff]  ;;  %v81_v14 = vld [vmem:[#allocation3 + $0xf8] sm:$0xff] }
  0x98   :  { %898 = vmatprep.mubr.f32.mxu0 %v143_v59  ;;  %1482 = vmatprep.subr.bf16.mxu1 %v1481_v56  ;;  %v1497_v56 = vpack.c.bf16 %v305_v46, %v303_v45  ;;  %v175_v59 = vld [vmem:[#allocation3 + $0x3e8] sm:$0xff]  ;;  %v85_v17 = vld [vmem:[#allocation3 + $0x118] sm:$0xff] }
  0x99   :  { %577 = vmatmul.mubr.f32.gmra.mrb[22].mxu1 %v138_v63  ;;  %1610 = vmatprep.subr.bf16.mxu0 %v1609_v60  ;;  %v1625_v60 = vpack.c.bf16 %v433_v50, %v431_v49  ;;  %v174_v63 = vld [vmem:[#allocation3 + $0x3e0] sm:$0xff]  ;;  %v89_v18 = vld [vmem:[#allocation3 + $0x138] sm:$0xff] }
  0x9a   :  { %899 = vmatmul.mubr.f32.gmra.mrb[22].mxu0 %v142_v3  ;;  %1484 = vmatpush1.bf16.msra.mxu1 %v1483_v0  ;;  %v1627_v0 = vpack.c.bf16 %v432_v58, %v430_v57  ;;  %v52_v3 = vld [vmem:[#allocation3 + $0x10] sm:$0xff]  ;;  %v93_v21 = vld [vmem:[#allocation3 + $0x158] sm:$0xff] }
  0x9b   :  { %1612 = vmatpush1.bf16.msra.mxu0 %v1611_v4  ;;  %582 = vmatprep.mubr.f32.mxu1 %v147_v7  ;;  %v56_v4 = vld [vmem:[#allocation3 + $0x30] sm:$0xff]  ;;  %v97_v22 = vld [vmem:[#allocation3 + $0x178] sm:$0xff] }
  0x9c   :  { %904 = vmatprep.mubr.f32.mxu0 %v151_v11  ;;  %1486 = vmatprep.subr.bf16.mxu1 %v1485_v8  ;;  %v60_v7 = vld [vmem:[#allocation3 + $0x50] sm:$0xff]  ;;  %v101_v25 = vld [vmem:[#allocation3 + $0x198] sm:$0xff] }
  0x9d   :  { %583 = vmatmul.mubr.f32.gmra.mrb[24].mxu1 %v146_v15  ;;  %1614 = vmatprep.subr.bf16.mxu0 %v1613_v12  ;;  %v64_v8 = vld [vmem:[#allocation3 + $0x70] sm:$0xff]  ;;  %v105_v26 = vld [vmem:[#allocation3 + $0x1b8] sm:$0xff] }
  0x9e   :  { %905 = vmatmul.mubr.f32.gmra.mrb[24].mxu0 %v150_v19  ;;  %1488 = vmatpush1.bf16.msra.mxu1 %v1487_v16  ;;  %v68_v11 = vld [vmem:[#allocation3 + $0x90] sm:$0xff]  ;;  %v109_v29 = vld [vmem:[#allocation3 + $0x1d8] sm:$0xff] }
  0x9f   :  { %1616 = vmatpush1.bf16.msra.mxu0 %v1615_v20  ;;  %588 = vmatprep.mubr.f32.mxu1 %v155_v23  ;;  %v72_v12 = vld [vmem:[#allocation3 + $0xb0] sm:$0xff]  ;;  %v113_v30 = vld [vmem:[#allocation3 + $0x1f8] sm:$0xff] }
  0xa0   :  { %910 = vmatprep.mubr.f32.mxu0 %v159_v27  ;;  %1490 = vmatprep.subr.bf16.mxu1 %v1489_v24  ;;  %v76_v15 = vld [vmem:[#allocation3 + $0xd0] sm:$0xff]  ;;  %v117_v33 = vld [vmem:[#allocation3 + $0x218] sm:$0xff] }
  0xa1   :  { %589 = vmatmul.mubr.f32.gmra.mrb[26].mxu1 %v154_v31  ;;  %1618 = vmatprep.subr.bf16.mxu0 %v1617_v28  ;;  %v80_v16 = vld [vmem:[#allocation3 + $0xf0] sm:$0xff]  ;;  %v121_v34 = vld [vmem:[#allocation3 + $0x238] sm:$0xff] }
  0xa2   :  { %911 = vmatmul.mubr.f32.gmra.mrb[26].mxu0 %v158_v35  ;;  %1492 = vmatpush1.bf16.msra.mxu1 %v1491_v32  ;;  %v84_v19 = vld [vmem:[#allocation3 + $0x110] sm:$0xff]  ;;  %v125_v37 = vld [vmem:[#allocation3 + $0x258] sm:$0xff] }
  0xa3   :  { %1620 = vmatpush1.bf16.msra.mxu0 %v1619_v36  ;;  %594 = vmatprep.mubr.f32.mxu1 %v163_v39  ;;  %v88_v20 = vld [vmem:[#allocation3 + $0x130] sm:$0xff]  ;;  %v129_v38 = vld [vmem:[#allocation3 + $0x278] sm:$0xff] }
  0xa4   :  { %916 = vmatprep.mubr.f32.mxu0 %v167_v43  ;;  %1494 = vmatprep.subr.bf16.mxu1 %v1493_v40  ;;  %v92_v23 = vld [vmem:[#allocation3 + $0x150] sm:$0xff]  ;;  %v133_v41 = vld [vmem:[#allocation3 + $0x298] sm:$0xff] }
  0xa5   :  { %595 = vmatmul.mubr.f32.gmra.mrb[28].mxu1 %v162_v47  ;;  %1622 = vmatprep.subr.bf16.mxu0 %v1621_v44  ;;  %v96_v24 = vld [vmem:[#allocation3 + $0x170] sm:$0xff]  ;;  %v137_v42 = vld [vmem:[#allocation3 + $0x2b8] sm:$0xff] }
  0xa6   :  { %917 = vmatmul.mubr.f32.gmra.mrb[28].mxu0 %v166_v51  ;;  %1496 = vmatpush1.bf16.msra.mxu1 %v1495_v48  ;;  %v100_v27 = vld [vmem:[#allocation3 + $0x190] sm:$0xff]  ;;  %v141_v45 = vld [vmem:[#allocation3 + $0x2d8] sm:$0xff] }
  0xa7   :  { %1624 = vmatpush1.bf16.msra.mxu0 %v1623_v52  ;;  %600 = vmatprep.mubr.f32.mxu1 %v171_v55  ;;  %v104_v28 = vld [vmem:[#allocation3 + $0x1b0] sm:$0xff]  ;;  %v145_v46 = vld [vmem:[#allocation3 + $0x2f8] sm:$0xff] }
  0xa8   :  { %922 = vmatprep.mubr.f32.mxu0 %v175_v59  ;;  %1498 = vmatprep.subr.bf16.mxu1 %v1497_v56  ;;  %v108_v31 = vld [vmem:[#allocation3 + $0x1d0] sm:$0xff]  ;;  %v149_v49 = vld [vmem:[#allocation3 + $0x318] sm:$0xff] }
  0xa9   :  { %601 = vmatmul.mubr.f32.gmra.mrb[30].mxu1 %v170_v61  ;;  %1626 = vmatprep.subr.bf16.mxu0 %v1625_v60  ;;  %v112_v32 = vld [vmem:[#allocation3 + $0x1f0] sm:$0xff]  ;;  %v153_v50 = vld [vmem:[#allocation3 + $0x338] sm:$0xff] }
  0xaa   :  { %923 = vmatmul.mubr.f32.gmra.mrb[30].mxu0 %v174_v63  ;;  %1500 = vmatpush1.bf16.msra.mxu1 %v1499_v62  ;;  %v116_v35 = vld [vmem:[#allocation3 + $0x210] sm:$0xff]  ;;  %v157_v53 = vld [vmem:[#allocation3 + $0x358] sm:$0xff] }
  0xab   :  { %1628 = vmatpush1.bf16.msra.mxu0 %v1627_v0  ;;  %671 = vmatprep.mubr.f32.mxu1 %v53_v1  ;;  %v120_v36 = vld [vmem:[#allocation3 + $0x230] sm:$0xff]  ;;  %v161_v54 = vld [vmem:[#allocation3 + $0x378] sm:$0xff]  ;;  %v436_v1 = vlaneseq }
  0xac   :  { %993 = vmatprep.mubr.f32.mxu0 %v57_v2  ;;  %v124_v39 = vld [vmem:[#allocation3 + $0x250] sm:$0xff]  ;;  %v165_v57 = vld [vmem:[#allocation3 + $0x398] sm:$0xff] }
  0xad   :  { %672 = vmatmul.mubr.f32.vlgmr.msra.gmra.mrb[0].mxu1 %v52_v3  ;;  %v128_v40 = vld [vmem:[#allocation3 + $0x270] sm:$0xff]  ;;  %v169_v58 = vld [vmem:[#allocation3 + $0x3b8] sm:$0xff]  ;;  %v437_v2 = vshrl.u32 %v436_v1, 7 }
  0xae   :  { %994 = vmatmul.mubr.f32.vlgmr.msra.gmra.mrb[0].mxu0 %v56_v4  ;;  %677 = vmatprep.mubr.f32.mxu1 %v61_v5  ;;  %v132_v43 = vld [vmem:[#allocation3 + $0x290] sm:$0xff]  ;;  %v173_v61 = vld [vmem:[#allocation3 + $0x3d8] sm:$0xff] }
  0xaf   :  { %999 = vmatprep.mubr.f32.mxu0 %v65_v6  ;;  %v136_v44 = vld [vmem:[#allocation3 + $0x2b0] sm:$0xff]  ;;  %v177_v62 = vld [vmem:[#allocation3 + $0x3f8] sm:$0xff]  ;;  %v438_v3 = vsub.s32 0, %v437_v2  ;;  %v442_v5 = vsub.s32 1, %v437_v2 }
  0xb0   :  { %v140_v47 = vld [vmem:[#allocation3 + $0x2d0] sm:$0xff]  ;;  %v434_v4 = vld [vmem:[%s2100_s2] sm:$0x3] }
  0xb1   :  { %678 = vmatmul.mubr.f32.gmra.mrb[2].mxu1 %v60_v7  ;;  %v144_v48 = vld [vmem:[#allocation3 + $0x2f0] sm:$0xff]  ;;  %v1941_v6 = vrot.slane %v434_v4, %v438_v3  ;;  %v1943_v7 = vrot.slane %v434_v4, %v442_v5 }
  0xb2   :  { %1000 = vmatmul.mubr.f32.gmra.mrb[2].mxu0 %v64_v8  ;;  %683 = vmatprep.mubr.f32.mxu1 %v69_v9  ;;  %v148_v51 = vld [vmem:[#allocation3 + $0x310] sm:$0xff]  ;;  %v1122_v9 = vld [vmem:[%s2101_s3] sm:$0x3] }
  0xb3   :  { %1005 = vmatprep.mubr.f32.mxu0 %v73_v10  ;;  %v152_v52 = vld [vmem:[#allocation3 + $0x330] sm:$0xff] }
  0xb4   :  { %v156_v55 = vld [vmem:[#allocation3 + $0x350] sm:$0xff] }
  0xb5   :  { %684 = vmatmul.mubr.f32.gmra.mrb[4].mxu1 %v68_v11  ;;  %v160_v56 = vld [vmem:[#allocation3 + $0x370] sm:$0xff] }
  0xb6   :  { %1006 = vmatmul.mubr.f32.gmra.mrb[4].mxu0 %v72_v12  ;;  %689 = vmatprep.mubr.f32.mxu1 %v77_v13  ;;  %v164_v59 = vld [vmem:[#allocation3 + $0x390] sm:$0xff] }
  0xb7   :  { %1011 = vmatprep.mubr.f32.mxu0 %v81_v14  ;;  %v168_v60 = vld [vmem:[#allocation3 + $0x3b0] sm:$0xff] }
  0xb8   :  { %v172_v63 = vld [vmem:[#allocation3 + $0x3d0] sm:$0xff] }
  0xb9   :  { %690 = vmatmul.mubr.f32.gmra.mrb[6].mxu1 %v76_v15  ;;  %v176_v0 = vld [vmem:[#allocation3 + $0x3f0] sm:$0xff] }
  0xba   :  { %1012 = vmatmul.mubr.f32.gmra.mrb[6].mxu0 %v80_v16  ;;  %695 = vmatprep.mubr.f32.mxu1 %v85_v17  ;;  %v1950_v16 = vrot.slane %v1122_v9, %v438_v3 }
  0xbb   :  { %1017 = vmatprep.mubr.f32.mxu0 %v89_v18 }
  0xbd   :  { %696 = vmatmul.mubr.f32.gmra.mrb[8].mxu1 %v84_v19  ;;  %v1952_v19 = vrot.slane %v1122_v9, %v442_v5 }
  0xbe   :  { %1018 = vmatmul.mubr.f32.gmra.mrb[8].mxu0 %v88_v20  ;;  %701 = vmatprep.mubr.f32.mxu1 %v93_v21 }
  0xbf   :  { %1023 = vmatprep.mubr.f32.mxu0 %v97_v22 }
  0xc1   :  { %702 = vmatmul.mubr.f32.gmra.mrb[10].mxu1 %v92_v23 }
  0xc2   :  { %1024 = vmatmul.mubr.f32.gmra.mrb[10].mxu0 %v96_v24  ;;  %707 = vmatprep.mubr.f32.mxu1 %v101_v25 }
  0xc3   :  { %1029 = vmatprep.mubr.f32.mxu0 %v105_v26 }
  0xc5   :  { %708 = vmatmul.mubr.f32.gmra.mrb[12].mxu1 %v100_v27 }
  0xc6   :  { %1030 = vmatmul.mubr.f32.gmra.mrb[12].mxu0 %v104_v28  ;;  %713 = vmatprep.mubr.f32.mxu1 %v109_v29 }
  0xc7   :  { %1035 = vmatprep.mubr.f32.mxu0 %v113_v30 }
  0xc9   :  { %714 = vmatmul.mubr.f32.gmra.mrb[14].mxu1 %v108_v31 }
  0xca   :  { %1036 = vmatmul.mubr.f32.gmra.mrb[14].mxu0 %v112_v32  ;;  %719 = vmatprep.mubr.f32.mxu1 %v117_v33 }
  0xcb   :  { %1041 = vmatprep.mubr.f32.mxu0 %v121_v34 }
  0xcd   :  { %720 = vmatmul.mubr.f32.gmra.mrb[16].mxu1 %v116_v35 }
  0xce   :  { %1042 = vmatmul.mubr.f32.gmra.mrb[16].mxu0 %v120_v36  ;;  %725 = vmatprep.mubr.f32.mxu1 %v125_v37 }
  0xcf   :  { %1047 = vmatprep.mubr.f32.mxu0 %v129_v38 }
  0xd1   :  { %726 = vmatmul.mubr.f32.gmra.mrb[18].mxu1 %v124_v39 }
  0xd2   :  { %1048 = vmatmul.mubr.f32.gmra.mrb[18].mxu0 %v128_v40  ;;  %731 = vmatprep.mubr.f32.mxu1 %v133_v41 }
  0xd3   :  { %1053 = vmatprep.mubr.f32.mxu0 %v137_v42 }
  0xd5   :  { %732 = vmatmul.mubr.f32.gmra.mrb[20].mxu1 %v132_v43 }
  0xd6   :  { %1054 = vmatmul.mubr.f32.gmra.mrb[20].mxu0 %v136_v44  ;;  %737 = vmatprep.mubr.f32.mxu1 %v141_v45 }
  0xd7   :  { %1059 = vmatprep.mubr.f32.mxu0 %v145_v46 }
  0xd9   :  { %738 = vmatmul.mubr.f32.gmra.mrb[22].mxu1 %v140_v47 }
  0xda   :  { %1060 = vmatmul.mubr.f32.gmra.mrb[22].mxu0 %v144_v48  ;;  %743 = vmatprep.mubr.f32.mxu1 %v149_v49 }
  0xdb   :  { %1065 = vmatprep.mubr.f32.mxu0 %v153_v50 }
  0xdd   :  { %744 = vmatmul.mubr.f32.gmra.mrb[24].mxu1 %v148_v51 }
  0xde   :  { %1066 = vmatmul.mubr.f32.gmra.mrb[24].mxu0 %v152_v52  ;;  %749 = vmatprep.mubr.f32.mxu1 %v157_v53 }
  0xdf   :  { %1071 = vmatprep.mubr.f32.mxu0 %v161_v54 }
  0xe1   :  { %750 = vmatmul.mubr.f32.gmra.mrb[26].mxu1 %v156_v55 }
  0xe2   :  { %1072 = vmatmul.mubr.f32.gmra.mrb[26].mxu0 %v160_v56  ;;  %755 = vmatprep.mubr.f32.mxu1 %v165_v57 }
  0xe3   :  { %1077 = vmatprep.mubr.f32.mxu0 %v169_v58 }
  0xe5   :  { %756 = vmatmul.mubr.f32.gmra.mrb[28].mxu1 %v164_v59 }
  0xe6   :  { %1078 = vmatmul.mubr.f32.gmra.mrb[28].mxu0 %v168_v60  ;;  %761 = vmatprep.mubr.f32.mxu1 %v173_v61 }
  0xe7   :  { %1083 = vmatprep.mubr.f32.mxu0 %v177_v62 }
  0xe9   :  { %762 = vmatmul.mubr.f32.gmra.mrb[30].mxu1 %v172_v63 }
  0xea   :  { %1084 = vmatmul.mubr.f32.gmra.mrb[30].mxu0 %v176_v0 }
 0x180   :  { %v673_v8 = vpop.f32.mrb[0].mxu1 }
 0x181   :  { %v1629_v10 = vadd.f32 %v673_v8, %v1941_v6  ;;  %v995_v11 = vpop.f32.mrb[0].mxu0  ;;  %v675_v12 = vpop.f32.mrb[1].mxu1 }
 0x182   :  { %v1631_v13 = vadd.f32 %v675_v12, %v1943_v7  ;;  %v997_v14 = vpop.f32.mrb[1].mxu0 }
 0x183   :  { %v1630_v15 = vadd.f32 %v1629_v10, %v995_v11 }
 0x184   :  { %v1632_v17 = vadd.f32 %v1631_v13, %v997_v14  ;;  %v679_v18 = vpop.f32.mrb[2].mxu1 }
 0x185   :  { %v1090_v20 = vmax.f32 %v1630_v15, 0.0  ;;  %v1633_v21 = vadd.f32 %v679_v18, %v1941_v6  ;;  %v1001_v22 = vpop.f32.mrb[2].mxu0  ;;  %v681_v23 = vpop.f32.mrb[3].mxu1 }
 0x186   :  { %v1091_v24 = vmax.f32 %v1632_v17, 0.0  ;;  %v1635_v25 = vadd.f32 %v681_v23, %v1943_v7  ;;  %v1003_v26 = vpop.f32.mrb[3].mxu0 }
 0x187   :  { %v1634_v27 = vadd.f32 %v1633_v21, %v1001_v22  ;;  %v1134_v28 = vmul.f32 %v1950_v16, %v1090_v20 }
 0x188   :  { %v1636_v29 = vadd.f32 %v1635_v25, %v1003_v26  ;;  %v685_v30 = vpop.f32.mrb[4].mxu1  ;;  %v1135_v31 = vmul.f32 %v1952_v19, %v1091_v24 }
 0x189   :  { %v1092_v32 = vmax.f32 %v1634_v27, 0.0  ;;  %v1637_v33 = vadd.f32 %v685_v30, %v1941_v6  ;;  %v1007_v34 = vpop.f32.mrb[4].mxu0  ;;  %v687_v35 = vpop.f32.mrb[5].mxu1 }
 0x18a   :  { %v1093_v36 = vmax.f32 %v1636_v29, 0.0  ;;  %v1639_v37 = vadd.f32 %v687_v35, %v1943_v7  ;;  %v1009_v38 = vpop.f32.mrb[5].mxu0  ;;  %v1166_v39 = vadd.f32 %v1135_v31, %v1134_v28 }
 0x18b   :  { %v1136_v40 = vmul.f32 %v1950_v16, %v1092_v32  ;;  %v1638_v41 = vadd.f32 %v1637_v33, %v1007_v34 }
 0x18c   :  { %v1137_v42 = vmul.f32 %v1952_v19, %v1093_v36  ;;  %v1640_v43 = vadd.f32 %v1639_v37, %v1009_v38  ;;  %1167 = vadd.xlane.f32.xlu0 %v1166_v39  ;;  %v691_v44 = vpop.f32.mrb[6].mxu1 }
 0x18d   :  { %v1094_v45 = vmax.f32 %v1638_v41, 0.0  ;;  %v1013_v46 = vpop.f32.mrb[6].mxu0  ;;  %v1641_v47 = vadd.f32 %v691_v44, %v1941_v6  ;;  %v693_v48 = vpop.f32.mrb[7].mxu1 }
 0x18e   :  { %v1095_v49 = vmax.f32 %v1640_v43, 0.0  ;;  %v1643_v50 = vadd.f32 %v693_v48, %v1943_v7  ;;  %v1015_v51 = vpop.f32.mrb[7].mxu0  ;;  %v1169_v52 = vadd.f32 %v1137_v42, %v1136_v40 }
 0x18f   :  { %v1642_v53 = vadd.f32 %v1641_v47, %v1013_v46  ;;  %v1138_v54 = vmul.f32 %v1950_v16, %v1094_v45 }
 0x190   :  { %v1644_v55 = vadd.f32 %v1643_v50, %v1015_v51  ;;  %1170 = vadd.xlane.f32.xlu0 %v1169_v52  ;;  %v697_v56 = vpop.f32.mrb[8].mxu1  ;;  %v1139_v57 = vmul.f32 %v1952_v19, %v1095_v49 }
 0x191   :  { %v1096_v58 = vmax.f32 %v1642_v53, 0.0  ;;  %v1019_v59 = vpop.f32.mrb[8].mxu0  ;;  %v1645_v60 = vadd.f32 %v697_v56, %v1941_v6  ;;  %v699_v61 = vpop.f32.mrb[9].mxu1 }
 0x192   :  { %v1097_v62 = vmax.f32 %v1644_v55, 0.0  ;;  %v1647_v63 = vadd.f32 %v699_v61, %v1943_v7  ;;  %v1021_v0 = vpop.f32.mrb[9].mxu0  ;;  %v1172_v1 = vadd.f32 %v1139_v57, %v1138_v54 }
 0x193   :  { %v1646_v2 = vadd.f32 %v1645_v60, %v1019_v59  ;;  %v1140_v3 = vmul.f32 %v1950_v16, %v1096_v58 }
 0x194   :  { %v1141_v4 = vmul.f32 %v1952_v19, %v1097_v62  ;;  %v1648_v5 = vadd.f32 %v1647_v63, %v1021_v0  ;;  %1173 = vadd.xlane.f32.xlu1 %v1172_v1  ;;  %v703_v8 = vpop.f32.mrb[10].mxu1 }
 0x195   :  { %v1098_v9 = vmax.f32 %v1646_v2, 0.0  ;;  %v1025_v10 = vpop.f32.mrb[10].mxu0  ;;  %v1649_v11 = vadd.f32 %v703_v8, %v1941_v6  ;;  %v705_v12 = vpop.f32.mrb[11].mxu1 }
 0x196   :  { %v1099_v13 = vmax.f32 %v1648_v5, 0.0  ;;  %v1651_v14 = vadd.f32 %v705_v12, %v1943_v7  ;;  %v1027_v15 = vpop.f32.mrb[11].mxu0  ;;  %v1175_v17 = vadd.f32 %v1141_v4, %v1140_v3 }
 0x197   :  { %v1650_v18 = vadd.f32 %v1649_v11, %v1025_v10  ;;  %v1142_v20 = vmul.f32 %v1950_v16, %v1098_v9 }
 0x198   :  { %v1143_v21 = vmul.f32 %v1952_v19, %v1099_v13  ;;  %v1652_v22 = vadd.f32 %v1651_v14, %v1027_v15  ;;  %1176 = vadd.xlane.f32.xlu1 %v1175_v17  ;;  %v709_v23 = vpop.f32.mrb[12].mxu1 }
 0x199   :  { %v1100_v24 = vmax.f32 %v1650_v18, 0.0  ;;  %v1031_v25 = vpop.f32.mrb[12].mxu0  ;;  %v1653_v26 = vadd.f32 %v709_v23, %v1941_v6  ;;  %v711_v27 = vpop.f32.mrb[13].mxu1 }
 0x19a   :  { %v1101_v28 = vmax.f32 %v1652_v22, 0.0  ;;  %v1655_v29 = vadd.f32 %v711_v27, %v1943_v7  ;;  %v1033_v30 = vpop.f32.mrb[13].mxu0  ;;  %v1178_v31 = vadd.f32 %v1143_v21, %v1142_v20 }
 0x19b   :  { %v1654_v32 = vadd.f32 %v1653_v26, %v1031_v25  ;;  %v1144_v33 = vmul.f32 %v1950_v16, %v1100_v24 }
 0x19c   :  { %v1145_v34 = vmul.f32 %v1952_v19, %v1101_v28  ;;  %v1656_v35 = vadd.f32 %v1655_v29, %v1033_v30  ;;  %1179 = vadd.xlane.f32.xlu0 %v1178_v31  ;;  %v715_v36 = vpop.f32.mrb[14].mxu1 }
 0x19d   :  { %v1102_v37 = vmax.f32 %v1654_v32, 0.0  ;;  %v1037_v38 = vpop.f32.mrb[14].mxu0  ;;  %v1657_v39 = vadd.f32 %v715_v36, %v1941_v6  ;;  %v717_v40 = vpop.f32.mrb[15].mxu1 }
 0x19e   :  { %v1103_v41 = vmax.f32 %v1656_v35, 0.0  ;;  %v1659_v42 = vadd.f32 %v717_v40, %v1943_v7  ;;  %v1039_v43 = vpop.f32.mrb[15].mxu0  ;;  %v1181_v44 = vadd.f32 %v1145_v34, %v1144_v33 }
 0x19f   :  { %v1658_v45 = vadd.f32 %v1657_v39, %v1037_v38  ;;  %v1146_v46 = vmul.f32 %v1950_v16, %v1102_v37 }
 0x1a0   :  { %v1147_v47 = vmul.f32 %v1952_v19, %v1103_v41  ;;  %v1660_v48 = vadd.f32 %v1659_v42, %v1039_v43  ;;  %1182 = vadd.xlane.f32.xlu1 %v1181_v44  ;;  %v721_v49 = vpop.f32.mrb[16].mxu1 }
 0x1a1   :  { %v1104_v50 = vmax.f32 %v1658_v45, 0.0  ;;  %v1043_v51 = vpop.f32.mrb[16].mxu0  ;;  %v1661_v52 = vadd.f32 %v721_v49, %v1941_v6  ;;  %v723_v53 = vpop.f32.mrb[17].mxu1 }
 0x1a2   :  { %v1105_v54 = vmax.f32 %v1660_v48, 0.0  ;;  %v1663_v55 = vadd.f32 %v723_v53, %v1943_v7  ;;  %v1045_v56 = vpop.f32.mrb[17].mxu0  ;;  %v1184_v57 = vadd.f32 %v1147_v47, %v1146_v46 }
 0x1a3   :  { %v1662_v58 = vadd.f32 %v1661_v52, %v1043_v51  ;;  %v1148_v59 = vmul.f32 %v1950_v16, %v1104_v50 }
 0x1a4   :  { %v1149_v60 = vmul.f32 %v1952_v19, %v1105_v54  ;;  %v1664_v61 = vadd.f32 %v1663_v55, %v1045_v56  ;;  %1185 = vadd.xlane.f32.xlu0 %v1184_v57  ;;  %v727_v62 = vpop.f32.mrb[18].mxu1 }
 0x1a5   :  { %v1106_v63 = vmax.f32 %v1662_v58, 0.0  ;;  %v1049_v0 = vpop.f32.mrb[18].mxu0  ;;  %v1665_v1 = vadd.f32 %v727_v62, %v1941_v6  ;;  %v729_v2 = vpop.f32.mrb[19].mxu1 }
 0x1a6   :  { %v1107_v3 = vmax.f32 %v1664_v61, 0.0  ;;  %v1667_v4 = vadd.f32 %v729_v2, %v1943_v7  ;;  %v1051_v5 = vpop.f32.mrb[19].mxu0  ;;  %v1187_v8 = vadd.f32 %v1149_v60, %v1148_v59 }
 0x1a7   :  { %v1666_v9 = vadd.f32 %v1665_v1, %v1049_v0  ;;  %v1150_v10 = vmul.f32 %v1950_v16, %v1106_v63 }
 0x1a8   :  { %v1151_v11 = vmul.f32 %v1952_v19, %v1107_v3  ;;  %v1668_v12 = vadd.f32 %v1667_v4, %v1051_v5  ;;  %1188 = vadd.xlane.f32.xlu1 %v1187_v8  ;;  %v733_v13 = vpop.f32.mrb[20].mxu1 }
 0x1a9   :  { %v1108_v14 = vmax.f32 %v1666_v9, 0.0  ;;  %v1055_v15 = vpop.f32.mrb[20].mxu0  ;;  %v1669_v17 = vadd.f32 %v733_v13, %v1941_v6  ;;  %v735_v18 = vpop.f32.mrb[21].mxu1 }
 0x1aa   :  { %v1109_v20 = vmax.f32 %v1668_v12, 0.0  ;;  %v1671_v21 = vadd.f32 %v735_v18, %v1943_v7  ;;  %v1057_v22 = vpop.f32.mrb[21].mxu0  ;;  %v1190_v23 = vadd.f32 %v1151_v11, %v1150_v10 }
 0x1ab   :  { %v1670_v24 = vadd.f32 %v1669_v17, %v1055_v15  ;;  %v1152_v25 = vmul.f32 %v1950_v16, %v1108_v14 }
 0x1ac   :  { %v1153_v26 = vmul.f32 %v1952_v19, %v1109_v20  ;;  %v1672_v27 = vadd.f32 %v1671_v21, %v1057_v22  ;;  %1191 = vadd.xlane.f32.xlu0 %v1190_v23  ;;  %v739_v28 = vpop.f32.mrb[22].mxu1 }
 0x1ad   :  { %v1110_v29 = vmax.f32 %v1670_v24, 0.0  ;;  %v1061_v30 = vpop.f32.mrb[22].mxu0  ;;  %v1673_v31 = vadd.f32 %v739_v28, %v1941_v6  ;;  %v741_v32 = vpop.f32.mrb[23].mxu1 }
 0x1ae   :  { %v1111_v33 = vmax.f32 %v1672_v27, 0.0  ;;  %v1675_v34 = vadd.f32 %v741_v32, %v1943_v7  ;;  %v1063_v35 = vpop.f32.mrb[23].mxu0  ;;  %v1193_v36 = vadd.f32 %v1153_v26, %v1152_v25 }
 0x1af   :  { %v1674_v37 = vadd.f32 %v1673_v31, %v1061_v30  ;;  %v1154_v38 = vmul.f32 %v1950_v16, %v1110_v29 }
 0x1b0   :  { %v1155_v39 = vmul.f32 %v1952_v19, %v1111_v33  ;;  %v1676_v40 = vadd.f32 %v1675_v34, %v1063_v35  ;;  %1194 = vadd.xlane.f32.xlu1 %v1193_v36  ;;  %v745_v41 = vpop.f32.mrb[24].mxu1 }
 0x1b1   :  { %v1112_v42 = vmax.f32 %v1674_v37, 0.0  ;;  %v1067_v43 = vpop.f32.mrb[24].mxu0  ;;  %v1677_v44 = vadd.f32 %v745_v41, %v1941_v6  ;;  %v747_v45 = vpop.f32.mrb[25].mxu1 }
 0x1b2   :  { %v1113_v46 = vmax.f32 %v1676_v40, 0.0  ;;  %v1679_v47 = vadd.f32 %v747_v45, %v1943_v7  ;;  %v1069_v48 = vpop.f32.mrb[25].mxu0  ;;  %v1196_v49 = vadd.f32 %v1155_v39, %v1154_v38 }
 0x1b3   :  { %v1678_v50 = vadd.f32 %v1677_v44, %v1067_v43  ;;  %v1156_v51 = vmul.f32 %v1950_v16, %v1112_v42 }
 0x1b4   :  { %v1157_v52 = vmul.f32 %v1952_v19, %v1113_v46  ;;  %v1680_v53 = vadd.f32 %v1679_v47, %v1069_v48  ;;  %1197 = vadd.xlane.f32.xlu0 %v1196_v49  ;;  %v751_v54 = vpop.f32.mrb[26].mxu1 }
 0x1b5   :  { %v1114_v55 = vmax.f32 %v1678_v50, 0.0  ;;  %v1073_v56 = vpop.f32.mrb[26].mxu0  ;;  %v1681_v57 = vadd.f32 %v751_v54, %v1941_v6  ;;  %v753_v58 = vpop.f32.mrb[27].mxu1 }
 0x1b6   :  { %v1115_v59 = vmax.f32 %v1680_v53, 0.0  ;;  %v1683_v60 = vadd.f32 %v753_v58, %v1943_v7  ;;  %v1075_v61 = vpop.f32.mrb[27].mxu0  ;;  %v1199_v62 = vadd.f32 %v1157_v52, %v1156_v51 }
 0x1b7   :  { %v1682_v63 = vadd.f32 %v1681_v57, %v1073_v56  ;;  %v1158_v0 = vmul.f32 %v1950_v16, %v1114_v55 }
 0x1b8   :  { %v1159_v1 = vmul.f32 %v1952_v19, %v1115_v59  ;;  %v1684_v2 = vadd.f32 %v1683_v60, %v1075_v61  ;;  %1200 = vadd.xlane.f32.xlu1 %v1199_v62  ;;  %v757_v3 = vpop.f32.mrb[28].mxu1 }
 0x1b9   :  { %v1116_v4 = vmax.f32 %v1682_v63, 0.0  ;;  %v1079_v5 = vpop.f32.mrb[28].mxu0  ;;  %v1685_v8 = vadd.f32 %v757_v3, %v1941_v6  ;;  %v759_v9 = vpop.f32.mrb[29].mxu1 }
 0x1ba   :  { %v1117_v10 = vmax.f32 %v1684_v2, 0.0  ;;  %v1687_v11 = vadd.f32 %v759_v9, %v1943_v7  ;;  %v1081_v12 = vpop.f32.mrb[29].mxu0  ;;  %v1202_v13 = vadd.f32 %v1159_v1, %v1158_v0 }
 0x1bb   :  { %v1686_v14 = vadd.f32 %v1685_v8, %v1079_v5  ;;  %v1160_v15 = vmul.f32 %v1950_v16, %v1116_v4 }
 0x1bc   :  { %v1161_v17 = vmul.f32 %v1952_v19, %v1117_v10  ;;  %v1688_v18 = vadd.f32 %v1687_v11, %v1081_v12  ;;  %1203 = vadd.xlane.f32.xlu0 %v1202_v13  ;;  %v763_v20 = vpop.f32.mrb[30].mxu1 }
 0x1bd   :  { %v1118_v21 = vmax.f32 %v1686_v14, 0.0  ;;  %v1085_v22 = vpop.f32.mrb[30].mxu0  ;;  %v1689_v23 = vadd.f32 %v763_v20, %v1941_v6  ;;  %v765_v24 = vpop.f32.mrb[31].mxu1 }
 0x1be   :  { %v1119_v25 = vmax.f32 %v1688_v18, 0.0  ;;  %v1691_v26 = vadd.f32 %v765_v24, %v1943_v7  ;;  %v1087_v27 = vpop.f32.mrb[31].mxu0  ;;  %v1205_v28 = vadd.f32 %v1161_v17, %v1160_v15  ;;  %v2016_v7 = vld [vmem:[#allocation2] ss:$0 sm:$0xff] }
 0x1bf   :  { %v1690_v29 = vadd.f32 %v1689_v23, %v1085_v22  ;;  %v1162_v30 = vmul.f32 %v1950_v16, %v1118_v21 }
 0x1c0   :  { %v1163_v31 = vmul.f32 %v1952_v19, %v1119_v25  ;;  %v1692_v32 = vadd.f32 %v1691_v26, %v1087_v27  ;;  %1206 = vadd.xlane.f32.xlu1 %v1205_v28 }
 0x1c1   :  { %v1120_v33 = vmax.f32 %v1690_v29, 0.0 }
 0x1c2   :  { %v1121_v34 = vmax.f32 %v1692_v32, 0.0  ;;  %v1208_v35 = vadd.f32 %v1163_v31, %v1162_v30 }
 0x1c3   :  { %v1164_v36 = vmul.f32 %v1950_v16, %v1120_v33 }
 0x1c4   :  { %v1165_v6 = vmul.f32 %v1952_v19, %v1121_v34  ;;  %1209 = vadd.xlane.f32.xlu0 %v1208_v35 }
 0x1c6   :  { %v1211_v37 = vadd.f32 %v1165_v6, %v1164_v36 }
 0x1c8   :  { %1212 = vadd.xlane.f32.xlu1 %v1211_v37 }
 0x219   :  { %v1168_v38 = vpop.xlane.xlu0 %1167 }
 0x21a   :  { %v1221_v39 = vadd.f32 %v2016_v7, %v1168_v38 }
 0x21c   :  { %v1357_v40 = vmul.f32 -1.442695, %v1221_v39 }
 0x21d   :  { %v1171_v41 = vpop.xlane.xlu0 %1170 }
 0x21e   :  { %1763 = vpow2.f32 %v1357_v40  ;;  %v1222_v42 = vadd.f32 %v2016_v7, %v1171_v41 }
 0x220   :  { %v1358_v43 = vmul.f32 -1.442695, %v1222_v42 }
 0x221   :  { %v1174_v44 = vpop.xlane.xlu1 %1173 }
 0x222   :  { %1765 = vpow2.f32 %v1358_v43  ;;  %v1223_v16 = vadd.f32 %v2016_v7, %v1174_v44 }
 0x224   :  { %v1359_v45 = vmul.f32 -1.442695, %v1223_v16 }
 0x225   :  { %v1177_v19 = vpop.xlane.xlu1 %1176 }
 0x226   :  { %1767 = vpow2.f32 %v1359_v45  ;;  %v1224_v46 = vadd.f32 %v2016_v7, %v1177_v19 }
 0x228   :  { %v1764_v47 = vpop.eup %1763  ;;  %v1360_v48 = vmul.f32 -1.442695, %v1224_v46 }
 0x229   :  { %v1285_v49 = vadd.f32 1.0, %v1764_v47  ;;  %v1180_v50 = vpop.xlane.xlu0 %1179 }
 0x22a   :  { %1769 = vpow2.f32 %v1360_v48  ;;  %v1225_v51 = vadd.f32 %v2016_v7, %v1180_v50 }
 0x22b   :  { %1771 = vrcp.f32 %v1285_v49 }
 0x22c   :  { %v1766_v52 = vpop.eup %1765  ;;  %v1361_v53 = vmul.f32 -1.442695, %v1225_v51 }
 0x22d   :  { %v1286_v54 = vadd.f32 1.0, %v1766_v52  ;;  %v1183_v55 = vpop.xlane.xlu1 %1182 }
 0x22e   :  { %1773 = vpow2.f32 %v1361_v53  ;;  %v1226_v56 = vadd.f32 %v2016_v7, %v1183_v55 }
 0x22f   :  { %1775 = vrcp.f32 %v1286_v54 }
 0x230   :  { %v1768_v57 = vpop.eup %1767  ;;  %v1362_v58 = vmul.f32 -1.442695, %v1226_v56 }
 0x231   :  { %v1287_v59 = vadd.f32 1.0, %v1768_v57  ;;  %v1186_v60 = vpop.xlane.xlu0 %1185 }
 0x232   :  { %1777 = vpow2.f32 %v1362_v58  ;;  %v1227_v61 = vadd.f32 %v2016_v7, %v1186_v60 }
 0x233   :  { %1779 = vrcp.f32 %v1287_v59 }
 0x234   :  { %v1770_v62 = vpop.eup %1769  ;;  %v1363_v63 = vmul.f32 -1.442695, %v1227_v61 }
 0x235   :  { %v1772_v0 = vpop.eup %1771  ;;  %v1288_v1 = vadd.f32 1.0, %v1770_v62  ;;  %v1189_v2 = vpop.xlane.xlu1 %1188 }
 0x236   :  { %1334 = vst.msk [vmem:[%s2103_s5] sm:$0xff] %vm1333_vm0, %v1772_v0  ;;  %1781 = vpow2.f32 %v1363_v63  ;;  %v1228_v3 = vadd.f32 %v2016_v7, %v1189_v2 }
 0x237   :  { %1783 = vrcp.f32 %v1288_v1 }
 0x238   :  { %v1774_v4 = vpop.eup %1773  ;;  %v1364_v5 = vmul.f32 -1.442695, %v1228_v3 }
 0x239   :  { %v1776_v8 = vpop.eup %1775  ;;  %v1289_v9 = vadd.f32 1.0, %v1774_v4  ;;  %v1192_v10 = vpop.xlane.xlu0 %1191 }
 0x23a   :  { %1335 = vst.msk [vmem:[%s2103_s5 + $0x8] sm:$0xff] %vm1333_vm0, %v1776_v8  ;;  %1785 = vpow2.f32 %v1364_v5  ;;  %v1229_v11 = vadd.f32 %v2016_v7, %v1192_v10 }
 0x23b   :  { %1787 = vrcp.f32 %v1289_v9 }
 0x23c   :  { %v1778_v12 = vpop.eup %1777  ;;  %v1365_v13 = vmul.f32 -1.442695, %v1229_v11 }
 0x23d   :  { %v1780_v14 = vpop.eup %1779  ;;  %v1290_v15 = vadd.f32 1.0, %v1778_v12  ;;  %v1195_v17 = vpop.xlane.xlu1 %1194 }
 0x23e   :  { %1336 = vst.msk [vmem:[%s2103_s5 + $0x10] sm:$0xff] %vm1333_vm0, %v1780_v14  ;;  %1789 = vpow2.f32 %v1365_v13  ;;  %v1230_v18 = vadd.f32 %v2016_v7, %v1195_v17 }
 0x23f   :  { %1791 = vrcp.f32 %v1290_v15 }
 0x240   :  { %v1782_v20 = vpop.eup %1781  ;;  %v1366_v21 = vmul.f32 -1.442695, %v1230_v18 }
 0x241   :  { %v1784_v22 = vpop.eup %1783  ;;  %v1291_v23 = vadd.f32 1.0, %v1782_v20  ;;  %v1198_v24 = vpop.xlane.xlu0 %1197 }
 0x242   :  { %1337 = vst.msk [vmem:[%s2103_s5 + $0x18] sm:$0xff] %vm1333_vm0, %v1784_v22  ;;  %1793 = vpow2.f32 %v1366_v21  ;;  %v1231_v25 = vadd.f32 %v2016_v7, %v1198_v24 }
 0x243   :  { %1795 = vrcp.f32 %v1291_v23 }
 0x244   :  { %v1786_v26 = vpop.eup %1785  ;;  %v1367_v27 = vmul.f32 -1.442695, %v1231_v25 }
 0x245   :  { %v1788_v28 = vpop.eup %1787  ;;  %v1292_v29 = vadd.f32 1.0, %v1786_v26  ;;  %v1201_v30 = vpop.xlane.xlu1 %1200 }
 0x246   :  { %1338 = vst.msk [vmem:[%s2103_s5 + $0x20] sm:$0xff] %vm1333_vm0, %v1788_v28  ;;  %1797 = vpow2.f32 %v1367_v27  ;;  %v1232_v31 = vadd.f32 %v2016_v7, %v1201_v30 }
 0x247   :  { %1799 = vrcp.f32 %v1292_v29 }
 0x248   :  { %v1790_v32 = vpop.eup %1789  ;;  %v1368_v33 = vmul.f32 -1.442695, %v1232_v31 }
 0x249   :  { %v1792_v34 = vpop.eup %1791  ;;  %v1293_v35 = vadd.f32 1.0, %v1790_v32  ;;  %v1204_v36 = vpop.xlane.xlu0 %1203 }
 0x24a   :  { %1339 = vst.msk [vmem:[%s2103_s5 + $0x28] sm:$0xff] %vm1333_vm0, %v1792_v34  ;;  %1801 = vpow2.f32 %v1368_v33  ;;  %v1233_v6 = vadd.f32 %v2016_v7, %v1204_v36 }
 0x24b   :  { %1803 = vrcp.f32 %v1293_v35 }
 0x24c   :  { %v1794_v37 = vpop.eup %1793  ;;  %v1369_v38 = vmul.f32 -1.442695, %v1233_v6 }
 0x24d   :  { %v1796_v39 = vpop.eup %1795  ;;  %v1294_v40 = vadd.f32 1.0, %v1794_v37  ;;  %v1207_v41 = vpop.xlane.xlu1 %1206 }
 0x24e   :  { %1340 = vst.msk [vmem:[%s2103_s5 + $0x30] sm:$0xff] %vm1333_vm0, %v1796_v39  ;;  %1805 = vpow2.f32 %v1369_v38  ;;  %v1234_v42 = vadd.f32 %v2016_v7, %v1207_v41 }
 0x24f   :  { %1807 = vrcp.f32 %v1294_v40 }
 0x250   :  { %v1798_v43 = vpop.eup %1797  ;;  %v1370_v44 = vmul.f32 -1.442695, %v1234_v42 }
 0x251   :  { %v1800_v16 = vpop.eup %1799  ;;  %v1295_v45 = vadd.f32 1.0, %v1798_v43  ;;  %v1210_v19 = vpop.xlane.xlu0 %1209 }
 0x252   :  { %1341 = vst.msk [vmem:[%s2103_s5 + $0x38] sm:$0xff] %vm1333_vm0, %v1800_v16  ;;  %1809 = vpow2.f32 %v1370_v44  ;;  %v1235_v46 = vadd.f32 %v2016_v7, %v1210_v19 }
 0x253   :  { %1811 = vrcp.f32 %v1295_v45 }
 0x254   :  { %v1802_v47 = vpop.eup %1801  ;;  %v1371_v48 = vmul.f32 -1.442695, %v1235_v46 }
 0x255   :  { %v1804_v49 = vpop.eup %1803  ;;  %v1296_v50 = vadd.f32 1.0, %v1802_v47  ;;  %v1213_v51 = vpop.xlane.xlu1 %1212 }
 0x256   :  { %1342 = vst.msk [vmem:[%s2103_s5 + $0x40] sm:$0xff] %vm1333_vm0, %v1804_v49  ;;  %1813 = vpow2.f32 %v1371_v48  ;;  %v1236_v52 = vadd.f32 %v2016_v7, %v1213_v51 }
 0x257   :  { %1815 = vrcp.f32 %v1296_v50 }
 0x258   :  { %v1806_v53 = vpop.eup %1805  ;;  %v1372_v54 = vmul.f32 -1.442695, %v1236_v52 }
 0x259   :  { %v1808_v55 = vpop.eup %1807  ;;  %v1297_v56 = vadd.f32 1.0, %v1806_v53 }
 0x25a   :  { %1343 = vst.msk [vmem:[%s2103_s5 + $0x48] sm:$0xff] %vm1333_vm0, %v1808_v55  ;;  %1817 = vpow2.f32 %v1372_v54 }
 0x25b   :  { %1819 = vrcp.f32 %v1297_v56 }
 0x25c   :  { %v1810_v57 = vpop.eup %1809 }
 0x25d   :  { %v1812_v58 = vpop.eup %1811  ;;  %v1298_v59 = vadd.f32 1.0, %v1810_v57 }
 0x25e   :  { %1344 = vst.msk [vmem:[%s2103_s5 + $0x50] sm:$0xff] %vm1333_vm0, %v1812_v58 }
 0x25f   :  { %1821 = vrcp.f32 %v1298_v59 }
 0x260   :  { %v1814_v7 = vpop.eup %1813 }
 0x261   :  { %v1816_v60 = vpop.eup %1815  ;;  %v1299_v61 = vadd.f32 1.0, %v1814_v7 }
 0x262   :  { %1345 = vst.msk [vmem:[%s2103_s5 + $0x58] sm:$0xff] %vm1333_vm0, %v1816_v60 }
 0x263   :  { %1823 = vrcp.f32 %v1299_v61 }
 0x264   :  { %v1818_v62 = vpop.eup %1817 }
 0x265   :  { %v1820_v63 = vpop.eup %1819  ;;  %v1300_v0 = vadd.f32 1.0, %v1818_v62 }
 0x266   :  { %1346 = vst.msk [vmem:[%s2103_s5 + $0x60] sm:$0xff] %vm1333_vm0, %v1820_v63 }
 0x267   :  { %1825 = vrcp.f32 %v1300_v0 }
 0x269   :  { %v1822_v1 = vpop.eup %1821 }
 0x26a   :  { %1347 = vst.msk [vmem:[%s2103_s5 + $0x68] sm:$0xff] %vm1333_vm0, %v1822_v1 }
 0x26d   :  { %v1824_v2 = vpop.eup %1823 }
 0x26e   :  { %1348 = vst.msk [vmem:[%s2103_s5 + $0x70] sm:$0xff] %vm1333_vm0, %v1824_v2 }
 0x271   :  { %v1826_v3 = vpop.eup %1825 }
 0x272   :  { %1349 = vst.msk [vmem:[%s2103_s5 + $0x78] sm:$0xff] %vm1333_vm0, %v1826_v3 }
 0x273   :  { %1354 = vsyncpa [#allocation4], 1 }
 0x274   :  { %1355 = vsyncpa [#allocation6], 1 }

</bundles_post_ra>
